<compile_context>
chip_gen: v7x
topology: tpu7x:2x2x1
jax: 0.10.0
libtpu: 0.0.40
codegen_flags: <defaults>
</compile_context>

<pallas_src>
import functools
import math

import jax
import jax.numpy as jnp
from jax.experimental import pallas as pl
from jax.experimental.pallas import tpu as pltpu


_MAX_TILE_ROWS = 1024                       # HBM roofline tapers past ~512-1024 rows

# Generation-dependent knobs (selected from physical VMEM at call time).
_IO_BUDGET_BIG = 40 * 1024 * 1024           # v5e / v6e: 128 MiB physical VMEM
_VMEM_LIMIT_BIG = 96 * 1024 * 1024
_IO_BUDGET_SMALL = 20 * 1024 * 1024         # v7x (64 MiB per TC) or unknown
_VMEM_LIMIT_SMALL = 48 * 1024 * 1024


@functools.lru_cache(maxsize=1)
def _vmem_capacity_bytes():
    try:
        return int(pltpu.get_tpu_info().vmem_capacity_bytes)
    except Exception:  # interpret mode / older runtime: be conservative (v7x-like)
        return 64 * 1024 * 1024


def _choose_tile_rows(m_rows, row_width, itemsize, quantum, io_budget, two_cores):
    """Pick a row-tile size from a VMEM byte budget (mem-bound kernel).

    Per tile row we hold: double-buffered in + out tiles in the I/O dtype
    (4 * row_width * itemsize) plus ~3 f32 temporaries (upcast x, centered,
    squared / staging) of row_width elements each.
    """
    bytes_per_row = 4 * row_width * itemsize + 3 * row_width * 4
    tm = max(quantum, io_budget // bytes_per_row)
    tm = min(tm, _MAX_TILE_ROWS, m_rows)
    if tm < m_rows:
        tm = max(quantum, (tm // quantum) * quantum)   # sublane-aligned partial block
        tm = min(tm, m_rows)
    if two_cores and m_rows >= 2 * quantum:
        steps = pl.cdiv(m_rows, tm)
        if steps == 1:
            # A single step would leave one v7x TensorCore idle: split in two.
            tm = -(-pl.cdiv(m_rows, 2) // quantum) * quantum
            tm = min(tm, m_rows)
        elif steps % 2 == 1:
            # Prefer an even number of steps across the two TensorCores.
            tm_even = -(-pl.cdiv(m_rows, steps + 1) // quantum) * quantum
            if tm_even >= quantum:
                tm = min(tm_even, m_rows)
    return tm


def _ln_rows_kernel(x_ref, w_ref, b_ref, o_ref, *, eps):
    """One LayerNorm row per tile row (lane width == C)."""
    x = x_ref[...].astype(jnp.float32)                    # (tm, C)
    mean = jnp.mean(x, axis=-1, keepdims=True)
    c = x - mean
    var = jnp.mean(c * c, axis=-1, keepdims=True)         # biased, matches torch
    rstd = jax.lax.rsqrt(var + eps)
    o_ref[...] = (c * rstd * w_ref[...] + b_ref[...]).astype(o_ref.dtype)


def _ln_folded_kernel(x_ref, s_ref, st_ref, w_ref, b_ref, o_ref, *, eps, inv_c):
    """g LayerNorm rows folded per lane-dense tile row of width g*C.

    Segment reduce / broadcast run as small exact 0/1 matmuls on the otherwise
    idle MXU (precision=HIGHEST so the f32 operands are not rounded to bf16),
    keeping every vector op and HBM transfer at full 128-lane width.
    """
    hi = jax.lax.Precision.HIGHEST
    x = x_ref[...].astype(jnp.float32)                     # (tm, g*C)
    s = s_ref[...]                                         # (g*C, g_pad)  0/1
    st = st_ref[...]                                       # (g_pad, g*C)  0/1
    mean = jnp.dot(x, s, precision=hi,
                   preferred_element_type=jnp.float32) * inv_c           # (tm, g_pad)
    c = x - jnp.dot(mean, st, precision=hi,
                    preferred_element_type=jnp.float32)                  # (tm, g*C)
    var = jnp.dot(c * c, s, precision=hi,
                  preferred_element_type=jnp.float32) * inv_c            # (tm, g_pad)
    rstd = jax.lax.rsqrt(var + eps)
    y = c * jnp.dot(rstd, st, precision=hi, preferred_element_type=jnp.float32)
    o_ref[...] = (y * w_ref[...] + b_ref[...]).astype(o_ref.dtype)


def layernorm_general(x, weight=None, bias=None, *, eps=1e-5):
    """MetaFormer LayerNormGeneral forward (normalized_dim=(-1,), affine_shape=C).

    x: (..., C) channels-last.  weight/bias: (C,) or None.  Returns x's shape/dtype.
    """
    orig_shape = x.shape
    C = int(orig_shape[-1])
    M = int(math.prod(orig_shape[:-1])) if len(orig_shape) > 1 else 1
    itemsize = jnp.dtype(x.dtype).itemsize
    quantum = 16 if itemsize == 2 else 8          # bf16/fp16 pack 2 rows / sublane

    big_vmem = _vmem_capacity_bytes() >= 100 * 1024 * 1024   # v5e/v6e: 128 MiB; v7x: 64
    io_budget = _IO_BUDGET_BIG if big_vmem else _IO_BUDGET_SMALL
    vmem_limit = _VMEM_LIMIT_BIG if big_vmem else _VMEM_LIMIT_SMALL
    two_cores = not big_vmem                      # v7x proxy: 2 TCs share the grid

    w32 = (jnp.ones((C,), jnp.float32) if weight is None
           else weight.astype(jnp.float32).reshape(C))
    b32 = (jnp.zeros((C,), jnp.float32) if bias is None
           else bias.astype(jnp.float32).reshape(C))

    x2 = x.reshape(M, C)

    compiler_params = pltpu.CompilerParams(
        dimension_semantics=("parallel",),
        vmem_limit_bytes=vmem_limit,
    )

    # Fold g rows per kernel row so the lane axis is a dense multiple of 128.
    g = 128 // math.gcd(C, 128)                   # 1 when C % 128 == 0
    row_width = g * C
    fold_bytes_min = quantum * (4 * row_width * itemsize + 3 * row_width * 4)
    use_fold = (g > 1) and (M >= g) and (M % g == 0) and (fold_bytes_min <= io_budget)

    if use_fold:
        m_rows = M // g
        xf = x2.reshape(m_rows, row_width)        # contiguous -> free reshape, no pad
        tm = _choose_tile_rows(m_rows, row_width, itemsize, quantum, io_budget, two_cores)
        grid = (pl.cdiv(m_rows, tm),)
        w2 = jnp.tile(w32, g).reshape(1, row_width)
        b2 = jnp.tile(b32, g).reshape(1, row_width)
        g_pad = max(g, 8)                         # sublane-friendly small dim
        seg = jnp.arange(row_width, dtype=jnp.int32) // C
        s_mat = (seg[:, None] == jnp.arange(g_pad, dtype=jnp.int32)[None, :]
                 ).astype(jnp.float32)            # (row_width, g_pad) 0/1
        st_mat = s_mat.T                          # (g_pad, row_width) 0/1
        kernel = functools.partial(_ln_folded_kernel, eps=float(eps),
                                   inv_c=1.0 / float(C))
        out = pl.pallas_call(
            kernel,
            out_shape=jax.ShapeDtypeStruct((m_rows, row_width), x.dtype),
            grid_spec=pltpu.PrefetchScalarGridSpec(
                num_scalar_prefetch=0,
                grid=grid,
                in_specs=[
                    pl.BlockSpec((tm, row_width), lambda i: (i, 0)),      # x tile
                    pl.BlockSpec((row_width, g_pad), lambda i: (0, 0)),   # seg-sum mat
                    pl.BlockSpec((g_pad, row_width), lambda i: (0, 0)),   # broadcast mat
                    pl.BlockSpec((1, row_width), lambda i: (0, 0)),       # weight
                    pl.BlockSpec((1, row_width), lambda i: (0, 0)),       # bias
                ],
                out_specs=pl.BlockSpec((tm, row_width), lambda i: (i, 0)),
            ),
            compiler_params=compiler_params,
        )(xf, s_mat, st_mat, w2, b2)
    else:
        # Plain path: one LayerNorm row per tile row.  Used when C % 128 == 0
        # (fully lane-dense) and as the ragged-M fallback for small C (masked
        # lane stores, but zero extra pad/slice HBM passes).
        m_rows = M
        tm = _choose_tile_rows(m_rows, C, itemsize, quantum, io_budget, two_cores)
        grid = (pl.cdiv(m_rows, tm),)
        w2 = w32.reshape(1, C)
        b2 = b32.reshape(1, C)
        kernel = functools.partial(_ln_rows_kernel, eps=float(eps))
        out = pl.pallas_call(
            kernel,
            out_shape=jax.ShapeDtypeStruct((m_rows, C), x.dtype),
            grid_spec=pltpu.PrefetchScalarGridSpec(
                num_scalar_prefetch=0,
                grid=grid,
                in_specs=[
                    pl.BlockSpec((tm, C), lambda i: (i, 0)),   # x rows tile
                    pl.BlockSpec((1, C), lambda i: (0, 0)),    # weight (resident)
                    pl.BlockSpec((1, C), lambda i: (0, 0)),    # bias (resident)
                ],
                out_specs=pl.BlockSpec((tm, C), lambda i: (i, 0)),
            ),
            compiler_params=compiler_params,
        )(x2, w2, b2)

    return out.reshape(orig_shape)


def _reference(x, weight, bias, eps=1e-5):
    xf = x.astype(jnp.float32)
    c = xf - jnp.mean(xf, axis=-1, keepdims=True)
    s = jnp.mean(c * c, axis=-1, keepdims=True)
    y = c / jnp.sqrt(s + eps)
    y = y * weight.astype(jnp.float32) + bias.astype(jnp.float32)
    return y.astype(x.dtype)


if __name__ == "__main__":
    key = jax.random.PRNGKey(0)
    kx, kw, kb, kx2, kx3 = jax.random.split(key, 5)

    # Case 1: canonical (B, H, W, C) LayerNorm with small C
    # (lane-dense channel-folding path: C=32 -> g=4 rows folded into 128 lanes).
    B, H, W, C = 2, 16, 16, 32
    x = jax.random.normal(kx, (B, H, W, C), dtype=jnp.float32)
    weight = jnp.ones((C,), jnp.float32) + 0.01 * jax.random.normal(kw, (C,), jnp.float32)
    bias = 0.01 * jax.random.normal(kb, (C,), jnp.float32)

    out = jax.block_until_ready(layernorm_general(x, weight, bias, eps=1e-5))
    ref = _reference(x, weight, bias, eps=1e-5)
    assert out.shape == x.shape and out.dtype == x.dtype
    assert jnp.max(jnp.abs(out - ref)) < 1e-4, "fold path mismatch vs reference"

    # Case 2: C a multiple of 128 (plain lane-dense path, no folding).
    x128 = jax.random.normal(kx2, (1, 8, 8, 128), dtype=jnp.float32)
    w128 = jnp.ones((128,), jnp.float32)
    b128 = jnp.zeros((128,), jnp.float32)
    out128 = jax.block_until_ready(layernorm_general(x128, w128, b128))
    ref128 = _reference(x128, w128, b128)
    assert jnp.max(jnp.abs(out128 - ref128)) < 1e-4, "plain path mismatch vs reference"

    # Case 3: bf16 I/O + ragged row count (M % g != 0) -> masked plain-path
    # fallback; no wrapper-side pad / slice HBM passes.
    x_bf = jax.random.normal(kx3, (1, 5, 7, 32), dtype=jnp.float32).astype(jnp.bfloat16)
    out_bf = jax.block_until_ready(layernorm_general(x_bf, weight, bias))
    ref_bf = _reference(x_bf, weight, bias)
    assert out_bf.dtype == jnp.bfloat16 and out_bf.shape == x_bf.shape
    assert jnp.max(jnp.abs(out_bf.astype(jnp.float32) -
                           ref_bf.astype(jnp.float32))) < 0.08, "bf16 path mismatch"

    print("KERNEL_OK")
</pallas_src>

<mosaic_0001>
module attributes {stable_mosaic.version = 11 : i64} {
  func.func @_ln_folded_kernel(%arg0: i32, %arg1: memref<64x128xf32, #tpu.memory_space<vmem>>, %arg2: memref<128x8xf32, #tpu.memory_space<vmem>>, %arg3: memref<8x128xf32, #tpu.memory_space<vmem>>, %arg4: memref<1x128xf32, #tpu.memory_space<vmem>>, %arg5: memref<1x128xf32, #tpu.memory_space<vmem>>, %arg6: memref<64x128xf32, #tpu.memory_space<vmem>>) attributes {dimension_semantics = [#tpu.dimension_semantics<parallel>], iteration_bounds = array<i64: 2>, scalar_prefetch = 0 : i64, scratch_operands = 0 : i64, tpu.core_type = #tpu.core_type<tc>, window_params = [{transform_indices = @transform_0, window_bounds = array<i64: 64, 128>}, {pipeline_mode = #tpu.pipeline_mode<synchronous>, transform_indices = @transform_1, window_bounds = array<i64: 128, 8>}, {pipeline_mode = #tpu.pipeline_mode<synchronous>, transform_indices = @transform_2, window_bounds = array<i64: 8, 128>}, {pipeline_mode = #tpu.pipeline_mode<synchronous>, transform_indices = @transform_3, window_bounds = array<i64: 1, 128>}, {pipeline_mode = #tpu.pipeline_mode<synchronous>, transform_indices = @transform_4, window_bounds = array<i64: 1, 128>}, {transform_indices = @transform_5, window_bounds = array<i64: 64, 128>}]} {
    %c0 = arith.constant 0 : index
    %c0_0 = arith.constant 0 : index
    %0 = vector.load %arg1[%c0, %c0_0] : memref<64x128xf32, #tpu.memory_space<vmem>>, vector<64x128xf32>
    %c0_1 = arith.constant 0 : index
    %c0_2 = arith.constant 0 : index
    %1 = vector.load %arg2[%c0_1, %c0_2] : memref<128x8xf32, #tpu.memory_space<vmem>>, vector<128x8xf32>
    %c0_3 = arith.constant 0 : index
    %c0_4 = arith.constant 0 : index
    %2 = vector.load %arg3[%c0_3, %c0_4] : memref<8x128xf32, #tpu.memory_space<vmem>>, vector<8x128xf32>
    %cst = arith.constant dense<0.000000e+00> : vector<64x8xf32>
    %3 = tpu.matmul %0, %1, %cst {dimension_numbers = #tpu.dot_dimension_numbers<[1], [0], [0], [1], [0, 0, 1, 1], [], []>, precision = #tpu.contract_precision<fp32>} : vector<64x128xf32>, vector<128x8xf32>, vector<64x8xf32> -> vector<64x8xf32>
    %cst_5 = arith.constant 3.125000e-02 : f32
    %4 = vector.broadcast %cst_5 : f32 to vector<64x8xf32>
    %5 = arith.mulf %3, %4 : vector<64x8xf32>
    %cst_6 = arith.constant dense<0.000000e+00> : vector<64x128xf32>
    %6 = tpu.matmul %5, %2, %cst_6 {dimension_numbers = #tpu.dot_dimension_numbers<[1], [0], [0], [1], [0, 0, 1, 1], [], []>, precision = #tpu.contract_precision<fp32>} : vector<64x8xf32>, vector<8x128xf32>, vector<64x128xf32> -> vector<64x128xf32>
    %7 = arith.subf %0, %6 : vector<64x128xf32>
    %8 = arith.mulf %7, %7 : vector<64x128xf32>
    %cst_7 = arith.constant dense<0.000000e+00> : vector<64x8xf32>
    %9 = tpu.matmul %8, %1, %cst_7 {dimension_numbers = #tpu.dot_dimension_numbers<[1], [0], [0], [1], [0, 0, 1, 1], [], []>, precision = #tpu.contract_precision<fp32>} : vector<64x128xf32>, vector<128x8xf32>, vector<64x8xf32> -> vector<64x8xf32>
    %cst_8 = arith.constant 3.125000e-02 : f32
    %10 = vector.broadcast %cst_8 : f32 to vector<64x8xf32>
    %11 = arith.mulf %9, %10 : vector<64x8xf32>
    %cst_9 = arith.constant 9.99999974E-6 : f32
    %12 = vector.broadcast %cst_9 : f32 to vector<64x8xf32>
    %13 = arith.addf %11, %12 : vector<64x8xf32>
    %14 = math.rsqrt %13 : vector<64x8xf32>
    %cst_10 = arith.constant dense<0.000000e+00> : vector<64x128xf32>
    %15 = tpu.matmul %14, %2, %cst_10 {dimension_numbers = #tpu.dot_dimension_numbers<[1], [0], [0], [1], [0, 0, 1, 1], [], []>, precision = #tpu.contract_precision<fp32>} : vector<64x8xf32>, vector<8x128xf32>, vector<64x128xf32> -> vector<64x128xf32>
    %16 = arith.mulf %7, %15 : vector<64x128xf32>
    %c0_11 = arith.constant 0 : index
    %c0_12 = arith.constant 0 : index
    %17 = vector.load %arg4[%c0_11, %c0_12] : memref<1x128xf32, #tpu.memory_space<vmem>>, vector<1x128xf32>
    %18 = vector.broadcast %17 : vector<1x128xf32> to vector<64x128xf32>
    %19 = arith.mulf %16, %18 : vector<64x128xf32>
    %c0_13 = arith.constant 0 : index
    %c0_14 = arith.constant 0 : index
    %20 = vector.load %arg5[%c0_13, %c0_14] : memref<1x128xf32, #tpu.memory_space<vmem>>, vector<1x128xf32>
    %21 = vector.broadcast %20 : vector<1x128xf32> to vector<64x128xf32>
    %22 = arith.addf %19, %21 : vector<64x128xf32>
    %c0_15 = arith.constant 0 : index
    %c0_16 = arith.constant 0 : index
    %23 = vector.load %arg6[%c0_15, %c0_16] : memref<64x128xf32, #tpu.memory_space<vmem>>, vector<64x128xf32>
    tpu.vector_store %arg6[%c0_15, %c0_16], %22 {strides = array<i32>} : memref<64x128xf32, #tpu.memory_space<vmem>>, vector<64x128xf32>,
    return
  }
  func.func @transform_0(%arg0: i32) -> (i32, i32) {
    %c0_i32 = arith.constant 0 : i32
    %c0_i32_0 = arith.constant 0 : i32
    return %arg0, %c0_i32 : i32, i32
  }
  func.func @transform_1(%arg0: i32) -> (i32, i32) {
    %c0_i32 = arith.constant 0 : i32
    %c0_i32_0 = arith.constant 0 : i32
    %c0_i32_1 = arith.constant 0 : i32
    return %c0_i32, %c0_i32_0 : i32, i32
  }
  func.func @transform_2(%arg0: i32) -> (i32, i32) {
    %c0_i32 = arith.constant 0 : i32
    %c0_i32_0 = arith.constant 0 : i32
    %c0_i32_1 = arith.constant 0 : i32
    return %c0_i32, %c0_i32_0 : i32, i32
  }
  func.func @transform_3(%arg0: i32) -> (i32, i32) {
    %c0_i32 = arith.constant 0 : i32
    %c0_i32_0 = arith.constant 0 : i32
    %c0_i32_1 = arith.constant 0 : i32
    return %c0_i32, %c0_i32_0 : i32, i32
  }
  func.func @transform_4(%arg0: i32) -> (i32, i32) {
    %c0_i32 = arith.constant 0 : i32
    %c0_i32_0 = arith.constant 0 : i32
    %c0_i32_1 = arith.constant 0 : i32
    return %c0_i32, %c0_i32_0 : i32, i32
  }
  func.func @transform_5(%arg0: i32) -> (i32, i32) {
    %c0_i32 = arith.constant 0 : i32
    %c0_i32_0 = arith.constant 0 : i32
    return %arg0, %c0_i32 : i32, i32
  }
}

</mosaic_0001>

<bundles_post_ra>
// kernel: tpu_custom_call.1
= control target key start
LH: loop header
LB: loop body
LE: loop exit
PB: predicated region body
PF: predicated region fallthrough
CT: control target
= control target key end

     0   :  { %10 = vsyncpa [#allocation3], 0  ;;  %s6808_s0 = inlined_call_operand.vmem [shape: f32[128,128], index: 0, kind: input, shape index: {}]   ;;  %s6809_s1 = inlined_call_operand.vmem [shape: f32[128,8], index: 1, kind: input, shape index: {}]   ;;  %s6810_s2 = inlined_call_operand.vmem [shape: f32[8,128], index: 2, kind: input, shape index: {}]   ;;  %s6811_s3 = inlined_call_operand.vmem [shape: f32[1,128], index: 3, kind: input, shape index: {}]   ;;  %s6812_s4 = inlined_call_operand.vmem [shape: f32[1,128], index: 4, kind: input, shape index: {}]   ;;  %s6813_s5 = inlined_call_operand.hbm [shape: f32[128,128], index: 5, kind: output, shape index: {}]  }
   0x1   :  { %12 = vsyncpa [#allocation3 + $0x1], 0  ;;  %s5655_s18 = smov 0   ;;  %s5657_s19 = smov 0  }
   0x2   :  { %s5659_s20 = smov 0   ;;  %s5661_s21 = smov 0  }
   0x3 LB: > { %s5676_s22 = sadd.s32 4294967295, %s5620_s21   ;;  %s3848_s23 = sadd.s32 4294967294, %s5620_s21   ;;  %s5620_s21 = sphi %s5661_s21, %s6946_s21   ;;  %s5616_s20 = sphi %s5659_s20, %s6945_s20   ;;  %s5612_s19 = sphi %s5657_s19, %s6944_s19   ;;  %s5608_s18 = sphi %s5655_s18, %s6943_s18  }
   0x4   : > { %s5680_s24 = sadd.s32 1, %s5620_s21   ;;  %s135_s25 = sadd.s32 1, %s5616_s20 }
   0x5   : > { %s132_s26 = ssub.s32 %s5620_s21, %s5680_s24  ;;  %p145_p0 = scmp.ne.s32.totalorder %s5616_s20, %s5612_s19 }
   0x6   : > { %p133_p1 = scmp.eq.s32.totalorder %s132_s26, 0  ;;  %p146_p2 = scmp.eq.s32.totalorder %s5676_s22, 1 }
   0x7   : > { %p151_p3 = scmp.ne.s32.totalorder %s5612_s19, %s5608_s18  ;;  %p152_p4 = scmp.eq.s32.totalorder %s3848_s23, 1 }
   0x8   : > { %s5691_s27 = scalar_select %p133_p1, %s5616_s20, %s135_s25  }
   0x9   : > { %p5693_p5 = por %p146_p2, %p145_p0  ;;  %p5697_p6 = por %p152_p4, %p151_p3 }
   0xa   : > { %p3851_p7 = scmp.ge.s32.totalorder %s5620_s21, 1  ;;  %p191_p8 = scmp.lt.s32.totalorder %s5620_s21, 3 }
   0xc   : > { %p192_p9 = pnand %p3851_p7, %p191_p8 }
   0xe   : > { %195 = sbr.rel (%p192_p9) target bundleno = 1477 (0x5c5), region = 40 }
  0x15   : > { %v234_v0 = vld [vmem:[%s6809_s1] sm:$0xff]  ;;  %v235_v1 = vld [vmem:[%s6809_s1 + $0x8] sm:$0xff]  ;;  %v236_v2 = vld [vmem:[%s6809_s1 + $0x10] sm:$0xff]  ;;  %s3853_s11 = sshll.u32 %s5676_s22, 3  ;;  %vm1201_vm0 = vcmask 64512   ;;  %s216_s13 = sand.u32 1, %s5612_s19  }
  0x16   : > { %v252_v3 = vand.u32 4294901760, %v234_v0  ;;  %v255_v4 = vand.u32 4294901760, %v235_v1  ;;  %v237_v5 = vld [vmem:[%s6809_s1 + $0x18] sm:$0xff]  ;;  %v258_v6 = vand.u32 4294901760, %v236_v2  ;;  %v238_v7 = vld [vmem:[%s6809_s1 + $0x20] sm:$0xff]  ;;  %v239_v8 = vld [vmem:[%s6809_s1 + $0x28] sm:$0xff] }
  0x17   : > { %v261_v9 = vand.u32 4294901760, %v237_v5  ;;  %v264_v11 = vand.u32 4294901760, %v238_v7  ;;  %v267_v12 = vand.u32 4294901760, %v239_v8  ;;  %v240_v14 = vld [vmem:[%s6809_s1 + $0x30] sm:$0xff]  ;;  %v5732_v15 = vld [vmem:[%s6809_s1 + $0x38] sm:$0xff]  ;;  %p220_p10 = scmp.lt.s32.totalorder %s3853_s11, 15 }
  0x18   : > { %v5722_v10 = vpack.c.bf16 %v255_v4, %v252_v3  ;;  %v270_v17 = vand.u32 4294901760, %v240_v14  ;;  %v273_v18 = vand.u32 4294901760, %v5732_v15  ;;  %v5743_v19 = vld [vmem:[%s6809_s1 + $0x40] sm:$0xff]  ;;  %v5748_v20 = vld [vmem:[%s6809_s1 + $0x48] sm:$0xff]  ;;  %v5761_v24 = vsub.f32 %v234_v0, %v252_v3  ;;  %v5771_v27 = vld [vmem:[%s6809_s1 + $0x50] sm:$0xff]  ;;  %s3852_s15 = sshll.u32 %s216_s13, 6 }
  0x19   : > { %v5724_v13 = vpack.c.bf16 %v261_v9, %v258_v6  ;;  %s6948_s11 = smov (!%p220_p10, %s3853_s11), 15  ;;  %v5737_v16 = vpack.c.bf16 %v267_v12, %v264_v11  ;;  %v276_v21 = vand.u32 4294901760, %v5743_v19  ;;  %v279_v22 = vand.u32 4294901760, %v5748_v20  ;;  %v5776_v28 = vld [vmem:[%s6809_s1 + $0x58] sm:$0xff]  ;;  %v5788_v32 = vld [vmem:[%s6809_s1 + $0x60] sm:$0xff]  ;;  %v5816_v42 = vld [vmem:[%s6809_s1 + $0x68] sm:$0xff] }
  0x1a   : > { %4956 = vmatprep.subr.bf16.mxu0 %v5722_v10  ;;  %s3854_s10 = sshll.u32 %s6948_s11, 3  ;;  %v5763_v25 = vsub.f32 %v235_v1, %v255_v4  ;;  %v5766_v26 = vpack.c.bf16 %v273_v18, %v270_v17  ;;  %v5781_v30 = vsub.f32 %v236_v2, %v258_v6  ;;  %v5783_v31 = vsub.f32 %v237_v5, %v261_v9  ;;  %v5831_v49 = vld [vmem:[%s6809_s1 + $0x70] sm:$0xff]  ;;  %v5836_v50 = vld [vmem:[%s6809_s1 + $0x78] sm:$0xff]  ;;  %s6742_s23 = scalar_lea.vmem [#allocation2], %s3852_s15 }
  0x1b   : > { %4958 = vmatpush3.bf16.msra.mxu0 %v5722_v10  ;;  %6870 = vst [vmem:[#allocation5_spill] sm:$0xff] %v5737_v16  ;;  %s5753_s14 = scalar_lea.vmem %s6808_s0, %s3854_s10  ;;  %v5797_v35 = vsub.f32 %v238_v7, %v264_v11  ;;  %v5799_v36 = vsub.f32 %v239_v8, %v267_v12  ;;  %v282_v37 = vand.u32 4294901760, %v5771_v27  ;;  %v285_v38 = vand.u32 4294901760, %v5776_v28  ;;  %s3862_s25 = sshll.u32 %s5676_s22, 10 }
  0x1c   : > { %4960 = vmatprep.subr.bf16.mxu0 %v5724_v13  ;;  %v5759_v23 = vld [vmem:[%s5753_s14] sm:$0xff]  ;;  %6872 = vst [vmem:[#allocation7_spill] sm:$0xff] %v5766_v26  ;;  %v5795_v34 = vld [vmem:[%s5753_s14 + $0x8] sm:$0xff]  ;;  %v6821_v39 = vand.u32 4294901760, %v5761_v24  ;;  %v6820_v40 = vand.u32 4294901760, %v5763_v25  ;;  %v5811_v41 = vpack.c.bf16 %v279_v22, %v276_v21  ;;  %v6818_v44 = vand.u32 4294901760, %v5781_v30  ;;  %s6759_s7 = scalar_lea.hbm %s6813_s5, %s3862_s25 }
  0x1d   : > { %6871 = vst [vmem:[#allocation6_spill] sm:$0xff] %v5759_v23  ;;  %v5779_v29 = vand.u32 4294901760, %v5759_v23  ;;  %6873 = vst [vmem:[#allocation8_spill] sm:$0xff] %v5795_v34  ;;  %v6817_v45 = vand.u32 4294901760, %v5783_v31  ;;  %v5822_v46 = vld [vmem:[%s5753_s14 + $0x10] sm:$0xff]  ;;  %v6824_v47 = vand.u32 4294901760, %v5788_v32  ;;  %v5843_v54 = vsub.f32 %v240_v14, %v270_v17 }
  0x1e   : > { %6874 = vst [vmem:[#allocation9_spill] sm:$0xff] %v5811_v41  ;;  %6875 = vst [vmem:[#allocation10_spill] sm:$0xff] %v5822_v46  ;;  %v5826_v48 = vand.u32 4294901760, %v5795_v34  ;;  %v6816_v52 = vand.u32 4294901760, %v5797_v35  ;;  %v6815_v53 = vand.u32 4294901760, %v5799_v36  ;;  %v6822_v55 = vand.u32 4294901760, %v5816_v42 }
  0x1f   : > { %4962 = vmatpush3.bf16.msra.mxu0 %v5724_v13  ;;  %v5792_v33 = vsub.f32 %v5759_v23, %v5779_v29  ;;  %v416_v56 = vsub.f32 %v5761_v24, %v6821_v39  ;;  %v423_v57 = vsub.f32 %v5763_v25, %v6820_v40  ;;  %v5854_v58 = vand.u32 4294901760, %v5822_v46  ;;  %v5857_v59 = vld [vmem:[%s5753_s14 + $0x18] sm:$0xff]  ;;  %v5873_v0 = vld [vmem:[%s5753_s14 + $0x20] sm:$0xff]  ;;  %s3786_s26 = sshll.u32 %s6742_s23, 4  ;;  %s6767_s8 = scalar_lea.sflag [#allocation3], %s216_s13  ;;  %s6761_s26 = int_to_ptr.vmem [resolvable:$true] %s3786_s26 }
  0x20   : > { %4964 = vmatprep.subr.bf16.mxu0 %v5737_v16  ;;  %6876 = vst [vmem:[#allocation11_spill] sm:$0xff] %v5857_v59  ;;  %v5864_v60 = vpack.c.bf16 %v285_v38, %v282_v37  ;;  %v430_v62 = vsub.f32 %v5781_v30, %v6818_v44  ;;  %v437_v63 = vsub.f32 %v5783_v31, %v6817_v45  ;;  %6878 = vst [vmem:[#allocation13_spill] sm:$0xff] %v5873_v0  ;;  %s5558_s22 = scalar_lea.vmem %s6761_s26, 1024  ;;  %s5622_s9 = smov [#allocation2]  }
  0x21   : > { %v6814_v43 = vand.u32 4294901760, %v5792_v33  ;;  %v294_v1 = vand.u32 4294901760, %v5831_v49  ;;  %v297_v2 = vand.u32 4294901760, %v5836_v50  ;;  %v5879_v3 = vsub.f32 %v5795_v34, %v5826_v48  ;;  %p5559_p11 = scmp.ne.s32.totalorder %s6761_s26, %s5558_s22  ;;  %s5562_s10 = sshll.u32 %s5622_s9, 4  ;;  %s5563_s10 = int_to_ptr.vmem [resolvable:$false] %s5562_s10 }
  0x22   : > { %6877 = vst [vmem:[#allocation12_spill] sm:$0xff] %v5864_v60  ;;  %v5882_v4 = vsub.f32 %v5732_v15, %v273_v18  ;;  %v444_v5 = vsub.f32 %v5797_v35, %v6816_v52  ;;  %v451_v6 = vsub.f32 %v5799_v36, %v6815_v53  ;;  %v6819_v7 = vand.u32 4294901760, %v5843_v54  ;;  %s5564_s12 = scalar_lea.vmem %s5563_s10, 2048  ;;  %p5565_p0 = scmp.lt.s32.totalorder %s6761_s26, %s5563_s10 }
  0x23   : > { %4966 = vmatpush3.bf16.msra.mxu0 %v5737_v16  ;;  %v335_v51 = vsub.f32 %v5792_v33, %v6814_v43  ;;  %v5892_v8 = vand.u32 4294901760, %v5857_v59  ;;  %v417_v9 = vand.u32 4294901760, %v416_v56  ;;  %v424_v11 = vand.u32 4294901760, %v423_v57  ;;  %p5560_p12 = pnand %p5559_p11, %p5693_p5  ;;  %p5566_p1 = scmp.lt.s32.totalorder %s5564_s12, %s5558_s22 }
  0x24   : > { %4968 = vmatprep.subr.bf16.mxu0 %v5766_v26  ;;  %v5897_v12 = vsub.f32 %v5822_v46, %v5854_v58  ;;  %v5900_v14 = vand.u32 4294901760, %v5873_v0  ;;  %v5907_v15 = vpack.c.bf16 %v6822_v55, %v6824_v47  ;;  %v431_v17 = vand.u32 4294901760, %v430_v62  ;;  %v5924_v62 = vld [vmem:[%s5753_s14 + $0x30] sm:$0xff] }
  0x25   : > { %v336_v61 = vand.u32 4294901760, %v335_v51  ;;  %v438_v18 = vand.u32 4294901760, %v437_v63  ;;  %v5911_v51 = vsub.f32 %v5857_v59, %v5892_v8  ;;  %v6823_v56 = vand.u32 4294901760, %v5879_v3  ;;  %6881 = vst [vmem:[#allocation16_spill] sm:$0xff] %v5924_v62  ;;  %p5561_p13 = pneg %p5560_p12  ;;  %p5567_p2 = por %p5566_p1, %p5565_p0 }
  0x26   : > { %6879 = vst [vmem:[#allocation14_spill] sm:$0xff] %v5907_v15  ;;  %v464_v57 = vand.u32 4294901760, %v5882_v4  ;;  %v445_v43 = vand.u32 4294901760, %v444_v5  ;;  %v452_v53 = vand.u32 4294901760, %v451_v6  ;;  %v5921_v52 = vsub.f32 %v5843_v54, %v6819_v7 }
  0x27   : > { %4970 = vmatpush3.bf16.msra.mxu0 %v5766_v26  ;;  %4291 = vmatprep.mubr.f32.mxu0 %v336_v61  ;;  %v5916_v61 = vld [vmem:[%s5753_s14 + $0x28] sm:$0xff]  ;;  %v5927_v63 = vpack.c.bf16 %v297_v2, %v294_v1  ;;  %v5929_v45 = vpack.c.bf16 %v424_v11, %v417_v9  ;;  %v6825_v44 = vand.u32 4294901760, %v5897_v12  ;;  %v5934_v5 = vsub.f32 %v5873_v0, %v5900_v14  ;;  %p5568_p3 = pnand %p5567_p2, %p5561_p13 }
  0x28   : > { %4972 = vmatprep.subr.bf16.mxu0 %v5811_v41  ;;  %6880 = vst [vmem:[#allocation15_spill] sm:$0xff] %v5916_v61  ;;  %v5937_v6 = vpack.c.bf16 %v438_v18, %v431_v17  ;;  %v5942_v7 = vsub.f32 %v5743_v19, %v276_v21  ;;  %v6828_v40 = vand.u32 4294901760, %v5911_v51  ;;  %v5946_v9 = vand.u32 4294901760, %v5916_v61  ;;  %v5963_v21 = vld [vmem:[%s5753_s14 + $0x38] sm:$0xff] }
  0x29   : > { %6882 = vst [vmem:[#allocation17_spill] sm:$0xff] %v5927_v63  ;;  %6883 = vst [vmem:[#allocation18_spill] sm:$0xff] %v5929_v45  ;;  %v345_v11 = vsub.f32 %v5879_v3, %v6823_v56  ;;  %v5952_v39 = vsub.f32 %v5882_v4, %v464_v57  ;;  %v5957_v17 = vsub.f32 %v5748_v20, %v279_v22  ;;  %v5960_v19 = vand.u32 4294901760, %v5924_v62 }
  0x2a   : > { %6884 = vst [vmem:[#allocation19_spill] sm:$0xff] %v5963_v21  ;;  %v5965_v18 = vpack.c.bf16 %v452_v53, %v445_v43  ;;  %v459_v55 = vand.u32 4294901760, %v5921_v52  ;;  %v5971_v56 = vsub.f32 %v5771_v27, %v282_v37  ;;  %v5975_v47 = vsub.f32 %v5916_v61, %v5946_v9 }
  0x2b   : > { %4974 = vmatpush3.bf16.msra.mxu0 %v5811_v41  ;;  %v355_v20 = vsub.f32 %v5897_v12, %v6825_v44  ;;  %v5984_v22 = vsub.f32 %v5776_v28, %v285_v38  ;;  %v5989_v27 = vsub.f32 %v5924_v62, %v5960_v19  ;;  %v365_v37 = vsub.f32 %v5911_v51, %v6828_v40 }
  0x2c   : > { %4976 = vmatprep.subr.bf16.mxu0 %v5864_v60  ;;  %6885 = vst [vmem:[#allocation20_spill] sm:$0xff] %v5975_v47  ;;  %v6886_v52 = vand.u32 4294901760, %v5788_v32  ;;  %v6887_v28 = vand.u32 4294901760, %v5816_v42  ;;  %v6006_v44 = vand.u32 4294901760, %v5963_v21  ;;  %v471_v43 = vand.u32 4294901760, %v5942_v7 }
  0x2d   : > { %v6011_v0 = vsub.f32 %v5831_v49, %v294_v1  ;;  %v6014_v40 = vsub.f32 %v5836_v50, %v297_v2  ;;  %v478_v61 = vand.u32 4294901760, %v5957_v17  ;;  %v485_v62 = vand.u32 4294901760, %v5971_v56 }
  0x2e   : > { %v5998_v53 = vsub.f32 %v5788_v32, %v6886_v52  ;;  %v6003_v38 = vsub.f32 %v5816_v42, %v6887_v28  ;;  %v346_v32 = vand.u32 4294901760, %v345_v11  ;;  %v466_v52 = vand.u32 4294901760, %v5952_v39 }
  0x2f   : > { %4978 = vmatpush3.bf16.msra.mxu0 %v5864_v60  ;;  %v6020_v42 = vsub.f32 %v5963_v21, %v6006_v44  ;;  %v356_v28 = vand.u32 4294901760, %v355_v20  ;;  %v6888_v49 = vand.u32 4294901760, %v5934_v5  ;;  %v492_v39 = vand.u32 4294901760, %v5984_v22 }
  0x30   : > { %4980 = vmatprep.subr.bf16.mxu0 %v5907_v15  ;;  %v366_v2 = vand.u32 4294901760, %v365_v37  ;;  %v499_v11 = vand.u32 4294901760, %v5998_v53  ;;  %v506_v21 = vand.u32 4294901760, %v6003_v38  ;;  %v6889_v46 = vand.u32 4294901760, %v5975_v47 }
  0x31   : > { %v375_v1 = vsub.f32 %v5934_v5, %v6888_v49  ;;  %v513_v59 = vand.u32 4294901760, %v6011_v0  ;;  %v520_v23 = vand.u32 4294901760, %v6014_v40  ;;  %v6890_v49 = vand.u32 4294901760, %v5761_v24 }
  0x32   : > { %v385_v20 = vsub.f32 %v5975_v47, %v6889_v46  ;;  %v6891_v50 = vand.u32 4294901760, %v5763_v25  ;;  %v6853_v37 = vand.u32 4294901760, %v6020_v42  ;;  %v6894_v46 = vand.u32 4294901760, %v5797_v35 }
  0x33   : > { %4982 = vmatpush3.bf16.msra.mxu0 %v5907_v15  ;;  %v6893_v15 = vand.u32 4294901760, %v5783_v31  ;;  %v6895_v41 = vand.u32 4294901760, %v5799_v36  ;;  %v6896_v47 = vand.u32 4294901760, %v5843_v54 }
  0x34   : > { %4984 = vmatprep.subr.bf16.mxu0 %v5927_v63  ;;  %v6041_v34 = vpack.c.bf16 %v6891_v50, %v6890_v49  ;;  %v6897_v50 = vand.u32 4294901760, %v5989_v27 }
  0x35   : > { %v6054_v26 = vpack.c.bf16 %v6895_v41, %v6894_v46  ;;  %v6058_v16 = vpack.c.bf16 %v464_v57, %v6896_v47  ;;  %v472_v41 = vsub.f32 %v5942_v7, %v471_v43  ;;  %v479_v46 = vsub.f32 %v5957_v17, %v478_v61 }
  0x36   : > { %v395_v49 = vsub.f32 %v5989_v27, %v6897_v50  ;;  %v6071_v47 = vpack.c.bf16 %v506_v21, %v499_v11  ;;  %v6073_v57 = vpack.c.bf16 %v520_v23, %v513_v59  ;;  %v486_v50 = vsub.f32 %v5971_v56, %v485_v62 }
  0x37   : > { %4986 = vmatpush3.bf16.msra.mxu0 %v5927_v63  ;;  %v6892_v63 = vand.u32 4294901760, %v5781_v30 }
  0x38   : > { %4988 = vmatprep.subr.bf16.mxu0 %v5929_v45  ;;  %6899 = vst [vmem:[#allocation22_spill] sm:$0xff] %v6071_v47  ;;  %6900 = vst [vmem:[#allocation23_spill] sm:$0xff] %v6073_v57  ;;  %v473_v47 = vand.u32 4294901760, %v472_v41  ;;  %v480_v57 = vand.u32 4294901760, %v479_v46  ;;  %v521_v41 = vsub.f32 %v6014_v40, %v520_v23  ;;  %v6109_v23 = vpack.c.bf16 %v5763_v25, %v5761_v24 }
  0x39   : > { %v6048_v60 = vpack.c.bf16 %v6893_v15, %v6892_v63  ;;  %v6064_v15 = vpack.c.bf16 %v478_v61, %v471_v43  ;;  %v6066_v63 = vpack.c.bf16 %v492_v39, %v485_v62  ;;  %v396_v43 = vand.u32 4294901760, %v395_v49 }
  0x3a   : > { %4292 = vmatmul.mubr.f32.vlgmr.msra.gmra.mrb[0].mxu0 %v346_v32  ;;  %v376_v32 = vand.u32 4294901760, %v375_v1  ;;  %v405_v1 = vsub.f32 %v6020_v42, %v6853_v37  ;;  %v6082_v61 = vpack.c.bf16 %v466_v52, %v459_v55  ;;  %v6086_v62 = vpack.c.bf16 %v480_v57, %v473_v47 }
  0x3b   : > { %4990 = vmatpush3.bf16.msra.mxu0 %v5929_v45  ;;  %4294 = vmatprep.mubr.f32.mxu0 %v356_v28  ;;  %6898 = vst [vmem:[#allocation21_spill] sm:$0xff] %v6066_v63  ;;  %v386_v28 = vand.u32 4294901760, %v385_v20  ;;  %v493_v45 = vsub.f32 %v5984_v22, %v492_v39  ;;  %v487_v20 = vand.u32 4294901760, %v486_v50  ;;  %v500_v39 = vsub.f32 %v5998_v53, %v499_v11 }
  0x3c   : > { %4992 = vmatprep.subr.bf16.mxu0 %v5937_v6  ;;  %v514_v49 = vsub.f32 %v6011_v0, %v513_v59  ;;  %v522_v46 = vand.u32 4294901760, %v521_v41  ;;  %v6115_v59 = vpack.c.bf16 %v5783_v31, %v5781_v30  ;;  %v6123_v24 = vpack.c.bf16 %v5799_v36, %v5797_v35 }
  0x3d   : > { %v494_v37 = vand.u32 4294901760, %v493_v45  ;;  %v501_v52 = vand.u32 4294901760, %v500_v39  ;;  %v6131_v25 = vpack.c.bf16 %v5882_v4, %v5843_v54  ;;  %v6139_v30 = vpack.c.bf16 %v5957_v17, %v5942_v7  ;;  %v6902_v54 = vld [vmem:[#allocation20_spill] sm:$0xff]  ;;  %v6905_v7 = vld [vmem:[#allocation9_spill] sm:$0xff]  ;;  %v6907_v17 = vld [vmem:[#allocation14_spill] sm:$0xff] }
  0x3e   : > { %4295 = vmatmul.mubr.f32.gmra.mrb[2].mxu0 %v366_v2  ;;  %v406_v2 = vand.u32 4294901760, %v405_v1  ;;  %v515_v11 = vand.u32 4294901760, %v514_v49  ;;  %v6147_v31 = vpack.c.bf16 %v5984_v22, %v5971_v56  ;;  %v6153_v35 = vpack.c.bf16 %v6003_v38, %v5998_v53  ;;  %v6906_v56 = vld [vmem:[#allocation12_spill] sm:$0xff]  ;;  %v6908_v22 = vld [vmem:[#allocation17_spill] sm:$0xff] }
  0x3f   : > { %4994 = vmatpush3.bf16.msra.mxu0 %v5937_v6  ;;  %4297 = vmatprep.mubr.f32.mxu0 %v376_v32  ;;  %v507_v32 = vsub.f32 %v6003_v38, %v506_v21  ;;  %v6091_v55 = vpack.c.bf16 %v494_v37, %v487_v20  ;;  %v6159_v36 = vpack.c.bf16 %v6014_v40, %v6011_v0  ;;  %v6901_v40 = vld [vmem:[#allocation5_spill] sm:$0xff]  ;;  %v6903_v0 = vld [vmem:[#allocation7_spill] sm:$0xff]  ;;  %v6904_v4 = vand.u32 4294901760, %v5792_v33 }
  0x40   : > { %4996 = vmatprep.subr.bf16.mxu0 %v5965_v18  ;;  %v6103_v37 = vpack.c.bf16 %v522_v46, %v515_v11  ;;  %v6910_v53 = vand.u32 4294901760, %v5897_v12  ;;  %v6911_v38 = vand.u32 4294901760, %v5911_v51  ;;  %v6912_v47 = vand.u32 4294901760, %v5934_v5 }
  0x41   : > { %v508_v45 = vand.u32 4294901760, %v507_v32 }
  0x42   : > { %4298 = vmatmul.mubr.f32.gmra.mrb[4].mxu0 %v386_v28 }
  0x43   : > { %4998 = vmatpush3.bf16.msra.mxu0 %v5965_v18  ;;  %4300 = vmatprep.mubr.f32.mxu0 %v396_v43  ;;  %v6099_v21 = vpack.c.bf16 %v508_v45, %v501_v52 }
  0x44   : > { %5000 = vmatprep.subr.bf16.mxu0 %v6082_v61 }
  0x46   : > { %4301 = vmatmul.mubr.f32.gmra.mrb[6].mxu0 %v406_v2 }
  0x47   : > { %5002 = vmatpush3.bf16.msra.mxu0 %v6082_v61  ;;  %4335 = vmatprep.mubr.f32.mxu0 %v5779_v29 }
  0x48   : > { %5004 = vmatprep.subr.bf16.mxu0 %v6086_v62 }
  0x4b   : > { %5006 = vmatpush3.bf16.msra.mxu0 %v6086_v62 }
  0x4c   : > { %5008 = vmatprep.subr.bf16.mxu0 %v6091_v55 }
  0x4f   : > { %5010 = vmatpush3.bf16.msra.mxu0 %v6091_v55 }
  0x50   : > { %5012 = vmatprep.subr.bf16.mxu0 %v6099_v21 }
  0x53   : > { %5014 = vmatpush3.bf16.msra.mxu0 %v6099_v21 }
  0x54   : > { %5016 = vmatprep.subr.bf16.mxu0 %v6103_v37 }
  0x57   : > { %5018 = vmatpush3.bf16.msra.mxu0 %v6103_v37 }
  0x58   : > { %5020 = vmatprep.subr.bf16.mxu0 %v6109_v23 }
  0x5a   : > { %4336 = vmatmul.mubr.f32.vlgmr.msra.gmra.mrb[0].mxu0 %v5826_v48 }
  0x5b   : > { %5022 = vmatpush3.bf16.msra.mxu0 %v6109_v23  ;;  %4338 = vmatprep.mubr.f32.mxu0 %v5854_v58 }
  0x5c   : > { %5024 = vmatprep.subr.bf16.mxu0 %v6115_v59 }
  0x5e   : > { %4339 = vmatmul.mubr.f32.gmra.mrb[2].mxu0 %v5892_v8 }
  0x5f   : > { %5026 = vmatpush3.bf16.msra.mxu0 %v6115_v59  ;;  %4341 = vmatprep.mubr.f32.mxu0 %v5900_v14 }
  0x60   : > { %5028 = vmatprep.subr.bf16.mxu0 %v6123_v24 }
  0x62   : > { %4342 = vmatmul.mubr.f32.gmra.mrb[4].mxu0 %v5946_v9 }
  0x63   : > { %5030 = vmatpush3.bf16.msra.mxu0 %v6123_v24  ;;  %4344 = vmatprep.mubr.f32.mxu0 %v5960_v19 }
  0x64   : > { %5032 = vmatprep.subr.bf16.mxu0 %v6131_v25 }
  0x66   : > { %4345 = vmatmul.mubr.f32.gmra.mrb[6].mxu0 %v6006_v44 }
  0x67   : > { %5034 = vmatpush3.bf16.msra.mxu0 %v6131_v25  ;;  %4379 = vmatprep.mubr.f32.mxu0 %v5792_v33  ;;  %v6909_v33 = vand.u32 4294901760, %v5879_v3 }
  0x68   : > { %5036 = vmatprep.subr.bf16.mxu0 %v6139_v30 }
  0x6b   : > { %5038 = vmatpush3.bf16.msra.mxu0 %v6139_v30 }
  0x6c   : > { %5040 = vmatprep.subr.bf16.mxu0 %v6147_v31 }
  0x6f   : > { %5042 = vmatpush3.bf16.msra.mxu0 %v6147_v31 }
  0x70   : > { %5044 = vmatprep.subr.bf16.mxu0 %v6153_v35 }
  0x73   : > { %5046 = vmatpush3.bf16.msra.mxu0 %v6153_v35 }
  0x74   : > { %5048 = vmatprep.subr.bf16.mxu0 %v6159_v36 }
  0x77   : > { %5050 = vmatpush3.bf16.msra.mxu0 %v6159_v36 }
  0x78   : > { %5052 = vmatprep.subr.bf16.mxu0 %v5722_v10 }
  0x7a   : > { %4380 = vmatmul.mubr.f32.vlgmr.msra.gmra.mrb[0].mxu0 %v5879_v3  ;;  %v6913_v3 = vand.u32 4294901760, %v6902_v54 }
  0x7b   : > { %5054 = vmatpush3.bf16.msra.mxu0 %v5722_v10  ;;  %4382 = vmatprep.mubr.f32.mxu0 %v5897_v12  ;;  %v6914_v12 = vand.u32 4294901760, %v5989_v27 }
  0x7c   : > { %5056 = vmatprep.subr.bf16.mxu0 %v5724_v13 }
  0x7e   : > { %4383 = vmatmul.mubr.f32.gmra.mrb[2].mxu0 %v5911_v51  ;;  %v6915_v51 = vand.u32 4294901760, %v6020_v42 }
  0x7f   : > { %5058 = vmatpush3.bf16.msra.mxu0 %v5724_v13  ;;  %4385 = vmatprep.mubr.f32.mxu0 %v5934_v5  ;;  %v6916_v5 = vld [vmem:[#allocation22_spill] sm:$0xff] }
  0x80   : > { %5060 = vmatprep.subr.bf16.mxu0 %v6901_v40 }
  0x82   : > { %4386 = vmatmul.mubr.f32.gmra.mrb[4].mxu0 %v6902_v54 }
  0x83   : > { %5062 = vmatpush3.bf16.msra.mxu0 %v6901_v40  ;;  %4388 = vmatprep.mubr.f32.mxu0 %v5989_v27  ;;  %v6917_v27 = vld [vmem:[#allocation23_spill] sm:$0xff] }
  0x84   : > { %5064 = vmatprep.subr.bf16.mxu0 %v6903_v0 }
  0x86   : > { %4389 = vmatmul.mubr.f32.gmra.mrb[6].mxu0 %v6020_v42 }
  0x87   : > { %5066 = vmatpush3.bf16.msra.mxu0 %v6903_v0  ;;  %4423 = vmatprep.mubr.f32.mxu0 %v6904_v4 }
  0x88   : > { %5068 = vmatprep.subr.bf16.mxu0 %v6905_v7 }
  0x8b   : > { %5070 = vmatpush3.bf16.msra.mxu0 %v6905_v7 }
  0x8c   : > { %5072 = vmatprep.subr.bf16.mxu0 %v6906_v56 }
  0x8f   : > { %5074 = vmatpush3.bf16.msra.mxu0 %v6906_v56 }
  0x90   : > { %5076 = vmatprep.subr.bf16.mxu0 %v6907_v17 }
  0x93   : > { %5078 = vmatpush3.bf16.msra.mxu0 %v6907_v17 }
  0x94   : > { %5080 = vmatprep.subr.bf16.mxu0 %v6908_v22 }
  0x97   : > { %5082 = vmatpush3.bf16.msra.mxu0 %v6908_v22 }
  0x98   : > { %5084 = vmatprep.subr.bf16.mxu0 %v6041_v34 }
  0x9a   : > { %4424 = vmatmul.mubr.f32.vlgmr.msra.gmra.mrb[0].mxu0 %v6909_v33 }
  0x9b   : > { %5086 = vmatpush3.bf16.msra.mxu0 %v6041_v34  ;;  %4426 = vmatprep.mubr.f32.mxu0 %v6910_v53 }
  0x9c   : > { %5088 = vmatprep.subr.bf16.mxu0 %v6048_v60 }
  0x9e   : > { %4427 = vmatmul.mubr.f32.gmra.mrb[2].mxu0 %v6911_v38 }
  0x9f   : > { %5090 = vmatpush3.bf16.msra.mxu0 %v6048_v60  ;;  %4429 = vmatprep.mubr.f32.mxu0 %v6912_v47 }
  0xa0   : > { %5092 = vmatprep.subr.bf16.mxu0 %v6054_v26 }
  0xa2   : > { %4430 = vmatmul.mubr.f32.gmra.mrb[4].mxu0 %v6913_v3 }
  0xa3   : > { %5094 = vmatpush3.bf16.msra.mxu0 %v6054_v26  ;;  %4432 = vmatprep.mubr.f32.mxu0 %v6914_v12 }
  0xa4   : > { %5096 = vmatprep.subr.bf16.mxu0 %v6058_v16 }
  0xa6   : > { %4433 = vmatmul.mubr.f32.gmra.mrb[6].mxu0 %v6915_v51 }
  0xa7   : > { %5098 = vmatpush3.bf16.msra.mxu0 %v6058_v16  ;;  %4467 = vmatprep.mubr.f32.mxu0 %v5779_v29 }
  0xa8   : > { %5100 = vmatprep.subr.bf16.mxu0 %v6064_v15 }
  0xab   : > { %5102 = vmatpush3.bf16.msra.mxu0 %v6064_v15 }
  0xac   : > { %5104 = vmatprep.subr.bf16.mxu0 %v6066_v63 }
  0xaf   : > { %5106 = vmatpush3.bf16.msra.mxu0 %v6066_v63 }
  0xb0   : > { %5108 = vmatprep.subr.bf16.mxu0 %v6916_v5 }
  0xb3   : > { %5110 = vmatpush3.bf16.msra.mxu0 %v6916_v5 }
  0xb4   : > { %5112 = vmatprep.subr.bf16.mxu0 %v6917_v27 }
  0xb7   : > { %5114 = vmatpush3.bf16.msra.mxu0 %v6917_v27 }
  0xb8   : > { %5116 = vmatprep.subr.bf16.mxu0 %v5722_v10 }
  0xba   : > { %4468 = vmatmul.mubr.f32.vlgmr.msra.gmra.mrb[0].mxu0 %v5826_v48 }
  0xbb   : > { %5118 = vmatpush3.bf16.msra.mxu0 %v5722_v10  ;;  %4470 = vmatprep.mubr.f32.mxu0 %v5854_v58 }
  0xbc   : > { %5120 = vmatprep.subr.bf16.mxu0 %v5724_v13 }
  0xbe   : > { %4471 = vmatmul.mubr.f32.gmra.mrb[2].mxu0 %v5892_v8 }
  0xbf   : > { %5122 = vmatpush3.bf16.msra.mxu0 %v5724_v13  ;;  %4473 = vmatprep.mubr.f32.mxu0 %v5900_v14 }
  0xc0   : > { %5124 = vmatprep.subr.bf16.mxu0 %v6901_v40 }
  0xc2   : > { %4474 = vmatmul.mubr.f32.gmra.mrb[4].mxu0 %v5946_v9 }
  0xc3   : > { %5126 = vmatpush3.bf16.msra.mxu0 %v6901_v40  ;;  %4476 = vmatprep.mubr.f32.mxu0 %v5960_v19 }
  0xc4   : > { %5128 = vmatprep.subr.bf16.mxu0 %v6903_v0 }
  0xc6   : > { %4477 = vmatmul.mubr.f32.gmra.mrb[6].mxu0 %v6006_v44 }
  0xc7   : > { %5130 = vmatpush3.bf16.msra.mxu0 %v6903_v0  ;;  %4511 = vmatprep.mubr.f32.mxu0 %v5779_v29  ;;  %v250_v29 = vld [vmem:[%s6810_s2] sm:$0xff] }
  0xc8   : > { %5132 = vmatprep.subr.bf16.mxu0 %v6905_v7  ;;  %v6254_v42 = vand.u32 4294901760, %v250_v29 }
  0xca   : > { %4523 = vmatprep.subr.mxu1 %v6254_v42 }
  0xcb   : > { %5134 = vmatpush3.bf16.msra.mxu0 %v6905_v7  ;;  %4524 = vmatpush3.msra.mxu1 %v6254_v42 }
  0xcc   : > { %5136 = vmatprep.subr.bf16.mxu0 %v6906_v56 }
  0xcf   : > { %5138 = vmatpush3.bf16.msra.mxu0 %v6906_v56 }
  0xd0   : > { %5140 = vmatprep.subr.bf16.mxu0 %v6907_v17 }
  0xd3   : > { %5142 = vmatpush3.bf16.msra.mxu0 %v6907_v17 }
  0xd4   : > { %5144 = vmatprep.subr.bf16.mxu0 %v6908_v22 }
  0xd7   : > { %5146 = vmatpush3.bf16.msra.mxu0 %v6908_v22 }
  0xd8   : > { %4871 = vmatprep.subr.mxu0 %v6254_v42 }
  0xda   : > { %4512 = vmatmul.mubr.f32.vlgmr.msra.gmra.mrb[0].mxu0 %v5826_v48  ;;  %v6261_v48 = vsub.f32 %v250_v29, %v6254_v42 }
  0xdb   : > { %4514 = vmatprep.mubr.f32.mxu0 %v5854_v58  ;;  %4872 = vmatpush3.msra.mxu0 %v6254_v42 }
  0xdc   : > { %v6264_v58 = vand.u32 4294901760, %v6261_v48 }
  0xde   : > { %4515 = vmatmul.mubr.f32.gmra.mrb[2].mxu0 %v5892_v8 }
  0xdf   : > { %4517 = vmatprep.mubr.f32.mxu0 %v5900_v14 }
  0xe2   : > { %4518 = vmatmul.mubr.f32.gmra.mrb[4].mxu0 %v5946_v9 }
  0xe3   : > { %4520 = vmatprep.mubr.f32.mxu0 %v5960_v19 }
  0xe6   : > { %4521 = vmatmul.mubr.f32.gmra.mrb[6].mxu0 %v6006_v44  ;;  %v1376_v44 = vsub.f32 %v6261_v48, %v6264_v58 }
  0xe8   : > { %v6268_v8 = vand.u32 4294901760, %v1376_v44 }
  0xea   : > { %6918 = vst [vmem:[#allocation5_spill] sm:$0xff] %v6268_v8  ;;  %4537 = vmatprep.subr.mxu1 %v6268_v8  ;;  %4885 = vmatprep.subr.mxu0 %v6268_v8 }
 0x1ad   : > { %v4513_v14 = vpop.f32.mrb[0].mxu0 }
 0x1ae   : > { %v1194_v9 = vmul.f32 0.03125, %v4513_v14  ;;  %v1147_v19 = vpop.f32.mrb[1].mxu0 }
 0x1af   : > { %v1193_v57 = vmul.f32 0.03125, %v1147_v19 }
 0x1b0   : > { %v1206_v28 = vsel %vm1201_vm0, %v1194_v9, 0 }
 0x1b1   : > { %v6273_v1 = vand.u32 4294901760, %v1206_v28  ;;  %v1203_v50 = vsel %vm1201_vm0, %v1193_v57, 0  ;;  %v4516_v43 = vpop.f32.mrb[2].mxu0 }
 0x1b2   : > { %v6276_v2 = vand.u32 4294901760, %v1203_v50  ;;  %v1196_v20 = vmul.f32 0.03125, %v4516_v43  ;;  %v1159_v39 = vpop.f32.mrb[3].mxu0 }
 0x1b3   : > { %v6279_v32 = vsub.f32 %v1206_v28, %v6273_v1  ;;  %v1195_v52 = vmul.f32 0.03125, %v1159_v39 }
 0x1b4   : > { %v6282_v45 = vsub.f32 %v1203_v50, %v6276_v2  ;;  %v1212_v49 = vsel %vm1201_vm0, %v1196_v20, 0 }
 0x1b5   : > { %v6285_v41 = vand.u32 4294901760, %v1212_v49  ;;  %v1209_v11 = vsel %vm1201_vm0, %v1195_v52, 0  ;;  %v4519_v46 = vpop.f32.mrb[4].mxu0  ;;  %v6855_v54 = vand.u32 4294901760, %v6279_v32 }
 0x1b6   : > { %v6289_v4 = vand.u32 4294901760, %v1209_v11  ;;  %v1198_v33 = vmul.f32 0.03125, %v4519_v46  ;;  %v1171_v53 = vpop.f32.mrb[5].mxu0  ;;  %v6856_v38 = vand.u32 4294901760, %v6282_v45 }
 0x1b7   : > { %v6293_v47 = vsub.f32 %v1212_v49, %v6285_v41  ;;  %v1197_v3 = vmul.f32 0.03125, %v1171_v53  ;;  %v1305_v12 = vsub.f32 %v6279_v32, %v6855_v54 }
 0x1b8   : > { %v6299_v51 = vsub.f32 %v1209_v11, %v6289_v4  ;;  %v1218_v29 = vsel %vm1201_vm0, %v1198_v33, 0  ;;  %v1295_v44 = vsub.f32 %v6282_v45, %v6856_v38 }
 0x1b9   : > { %v6305_v14 = vand.u32 4294901760, %v1218_v29  ;;  %v1215_v9 = vsel %vm1201_vm0, %v1197_v3, 0  ;;  %v4522_v19 = vpop.f32.mrb[6].mxu0  ;;  %v6854_v57 = vand.u32 4294901760, %v6293_v47  ;;  %v1306_v11 = vand.u32 4294901760, %v1305_v12 }
 0x1ba   : > { %v6309_v28 = vand.u32 4294901760, %v1215_v9  ;;  %v1200_v50 = vmul.f32 0.03125, %v4522_v19  ;;  %v1183_v43 = vpop.f32.mrb[7].mxu0  ;;  %v1296_v20 = vand.u32 4294901760, %v1295_v44  ;;  %v1314_v39 = vand.u32 4294901760, %v6299_v51 }
 0x1bb   : > { %v6313_v52 = vsub.f32 %v1218_v29, %v6305_v14  ;;  %v1199_v49 = vmul.f32 0.03125, %v1183_v43  ;;  %v1325_v46 = vsub.f32 %v6293_v47, %v6854_v57 }
 0x1bc   : > { %v1333_v33 = vsub.f32 %v1215_v9, %v6309_v28  ;;  %v1224_v53 = vsel %vm1201_vm0, %v1200_v50, 0  ;;  %4525 = vmatprep.mubr.f32.mxu1 %v1296_v20  ;;  %v1315_v3 = vsub.f32 %v6299_v51, %v1314_v39 }
 0x1bd   : > { %v6321_v19 = vand.u32 4294901760, %v1224_v53  ;;  %v1221_v44 = vsel %vm1201_vm0, %v1199_v49, 0  ;;  %4526 = vmatmul.mubr.f32.vlgmr.msra.gmra.mrb[0].mxu1 %v1306_v11  ;;  %v1344_v29 = vand.u32 4294901760, %v6313_v52  ;;  %v1326_v54 = vand.u32 4294901760, %v1325_v46 }
 0x1be   : > { %v6325_v43 = vand.u32 4294901760, %v1221_v44  ;;  %4538 = vmatpush3.msra.mxu1 %v6268_v8  ;;  %v1316_v12 = vand.u32 4294901760, %v1315_v3  ;;  %v1334_v57 = vand.u32 4294901760, %v1333_v33 }
 0x1bf   : > { %v1363_v9 = vsub.f32 %v1224_v53, %v6321_v19  ;;  %v1345_v50 = vsub.f32 %v6313_v52, %v1344_v29  ;;  %4551 = vmatprep.subr.mxu1 %v6261_v48 }
 0x1c0   : > { %v1353_v20 = vsub.f32 %v1221_v44, %v6325_v43  ;;  %4528 = vmatprep.mubr.f32.mxu1 %v1316_v12  ;;  %v1335_v49 = vsub.f32 %v1333_v33, %v1334_v57 }
 0x1c1   : > { %4529 = vmatmul.mubr.f32.gmra.mrb[2].mxu1 %v1326_v54  ;;  %v1364_v11 = vand.u32 4294901760, %v1363_v9  ;;  %v1346_v5 = vand.u32 4294901760, %v1345_v50  ;;  %v6927_v50 = vld [vmem:[#allocation15_spill] sm:$0xff] }
 0x1c2   : > { %v1336_v38 = vand.u32 4294901760, %v1335_v49  ;;  %v1354_v27 = vand.u32 4294901760, %v1353_v20 }
 0x1c3   : > { %v1365_v63 = vsub.f32 %v1363_v9, %v1364_v11 }
 0x1c4   : > { %4531 = vmatprep.mubr.f32.mxu1 %v1336_v38  ;;  %v1355_v3 = vsub.f32 %v1353_v20, %v1354_v27 }
 0x1c5   : > { %4532 = vmatmul.mubr.f32.gmra.mrb[4].mxu1 %v1346_v5  ;;  %v1366_v53 = vand.u32 4294901760, %v1365_v63  ;;  %v6919_v63 = vand.u32 4294901760, %v6282_v45  ;;  %v6920_v5 = vand.u32 4294901760, %v6279_v32 }
 0x1c6   : > { %v1356_v8 = vand.u32 4294901760, %v1355_v3  ;;  %v6928_v3 = vld [vmem:[#allocation13_spill] sm:$0xff] }
 0x1c8   : > { %4534 = vmatprep.mubr.f32.mxu1 %v1356_v8  ;;  %v6921_v8 = vand.u32 4294901760, %v6293_v47 }
 0x1c9   : > { %4535 = vmatmul.mubr.f32.gmra.mrb[6].mxu1 %v1366_v53 }
 0x1ca   : > { %4539 = vmatprep.mubr.f32.mxu1 %v6276_v2 }
 0x1cd   : > { %4540 = vmatmul.mubr.f32.vlgmr.msra.gmra.mrb[0].mxu1 %v6273_v1 }
 0x1ce   : > { %4552 = vmatpush3.msra.mxu1 %v6261_v48  ;;  %4542 = vmatprep.mubr.f32.mxu1 %v6289_v4 }
 0x1cf   : > { %4565 = vmatprep.subr.mxu1 %v6254_v42 }
 0x1d1   : > { %4543 = vmatmul.mubr.f32.gmra.mrb[2].mxu1 %v6285_v41 }
 0x1d2   : > { %4545 = vmatprep.mubr.f32.mxu1 %v6309_v28 }
 0x1d5   : > { %4546 = vmatmul.mubr.f32.gmra.mrb[4].mxu1 %v6305_v14 }
 0x1d6   : > { %4548 = vmatprep.mubr.f32.mxu1 %v6325_v43 }
 0x1d9   : > { %4549 = vmatmul.mubr.f32.gmra.mrb[6].mxu1 %v6321_v19 }
 0x1da   : > { %4553 = vmatprep.mubr.f32.mxu1 %v6282_v45 }
 0x1dd   : > { %4554 = vmatmul.mubr.f32.vlgmr.msra.gmra.mrb[0].mxu1 %v6279_v32 }
 0x1de   : > { %4566 = vmatpush3.msra.mxu1 %v6254_v42  ;;  %4556 = vmatprep.mubr.f32.mxu1 %v6299_v51 }
 0x1df   : > { %4579 = vmatprep.subr.mxu1 %v6264_v58 }
 0x1e1   : > { %4557 = vmatmul.mubr.f32.gmra.mrb[2].mxu1 %v6293_v47 }
 0x1e2   : > { %4559 = vmatprep.mubr.f32.mxu1 %v1333_v33 }
 0x1e5   : > { %4560 = vmatmul.mubr.f32.gmra.mrb[4].mxu1 %v6313_v52  ;;  %v6926_v52 = vld [vmem:[#allocation10_spill] sm:$0xff] }
 0x1e6   : > { %4562 = vmatprep.mubr.f32.mxu1 %v1353_v20 }
 0x1e9   : > { %4563 = vmatmul.mubr.f32.gmra.mrb[6].mxu1 %v1363_v9 }
 0x1ea   : > { %4567 = vmatprep.mubr.f32.mxu1 %v6919_v63 }
 0x1ed   : > { %4568 = vmatmul.mubr.f32.vlgmr.msra.gmra.mrb[0].mxu1 %v6920_v5 }
 0x1ee   : > { %4580 = vmatpush3.msra.mxu1 %v6264_v58  ;;  %4570 = vmatprep.mubr.f32.mxu1 %v1314_v39 }
 0x1ef   : > { %4593 = vmatprep.subr.mxu1 %v6254_v42 }
 0x1f1   : > { %4571 = vmatmul.mubr.f32.gmra.mrb[2].mxu1 %v6921_v8 }
 0x1f2   : > { %4573 = vmatprep.mubr.f32.mxu1 %v1334_v57 }
 0x1f5   : > { %4574 = vmatmul.mubr.f32.gmra.mrb[4].mxu1 %v1344_v29 }
 0x1f6   : > { %4576 = vmatprep.mubr.f32.mxu1 %v1354_v27  ;;  %v6922_v27 = vld [vmem:[#allocation18_spill] sm:$0xff] }
 0x1f9   : > { %4577 = vmatmul.mubr.f32.gmra.mrb[6].mxu1 %v1364_v11 }
 0x1fa   : > { %4581 = vmatprep.mubr.f32.mxu1 %v6276_v2 }
 0x1fd   : > { %4582 = vmatmul.mubr.f32.vlgmr.msra.gmra.mrb[0].mxu1 %v6273_v1 }
 0x1fe   : > { %4594 = vmatpush3.msra.mxu1 %v6254_v42  ;;  %4584 = vmatprep.mubr.f32.mxu1 %v6289_v4 }
 0x1ff   : > { %5148 = vmatprep.subr.bf16.mxu1 %v5722_v10 }
 0x201   : > { %4585 = vmatmul.mubr.f32.gmra.mrb[2].mxu1 %v6285_v41 }
 0x202   : > { %4587 = vmatprep.mubr.f32.mxu1 %v6309_v28 }
 0x205   : > { %4588 = vmatmul.mubr.f32.gmra.mrb[4].mxu1 %v6305_v14 }
 0x206   : > { %4590 = vmatprep.mubr.f32.mxu1 %v6325_v43 }
 0x209   : > { %4591 = vmatmul.mubr.f32.gmra.mrb[6].mxu1 %v6321_v19 }
 0x20a   : > { %4595 = vmatprep.mubr.f32.mxu1 %v6276_v2  ;;  %v6923_v2 = vld [vmem:[#allocation8_spill] sm:$0xff] }
 0x20d   : > { %4596 = vmatmul.mubr.f32.vlgmr.msra.gmra.mrb[0].mxu1 %v6273_v1 }
 0x20e   : > { %4598 = vmatprep.mubr.f32.mxu1 %v6289_v4  ;;  %5150 = vmatpush3.bf16.msra.mxu1 %v5722_v10 }
 0x20f   : > { %5152 = vmatprep.subr.bf16.mxu1 %v5724_v13 }
 0x211   : > { %4599 = vmatmul.mubr.f32.gmra.mrb[2].mxu1 %v6285_v41  ;;  %v6924_v41 = vld [vmem:[#allocation6_spill] sm:$0xff] }
 0x212   : > { %4601 = vmatprep.mubr.f32.mxu1 %v6309_v28  ;;  %5154 = vmatpush3.bf16.msra.mxu1 %v5724_v13 }
 0x213   : > { %5156 = vmatprep.subr.bf16.mxu1 %v6901_v40 }
 0x215   : > { %4602 = vmatmul.mubr.f32.gmra.mrb[4].mxu1 %v6305_v14  ;;  %v6925_v14 = vld [vmem:[#allocation11_spill] sm:$0xff] }
 0x216   : > { %4604 = vmatprep.mubr.f32.mxu1 %v6325_v43  ;;  %5158 = vmatpush3.bf16.msra.mxu1 %v6901_v40 }
 0x217   : > { %5160 = vmatprep.subr.bf16.mxu1 %v6903_v0 }
 0x219   : > { %4605 = vmatmul.mubr.f32.gmra.mrb[6].mxu1 %v6321_v19 }
 0x21a   : > { %5162 = vmatpush3.bf16.msra.mxu1 %v6903_v0 }
 0x21b   : > { %5164 = vmatprep.subr.bf16.mxu1 %v6905_v7 }
 0x21e   : > { %5166 = vmatpush3.bf16.msra.mxu1 %v6905_v7 }
 0x21f   : > { %5168 = vmatprep.subr.bf16.mxu1 %v6906_v56 }
 0x222   : > { %5170 = vmatpush3.bf16.msra.mxu1 %v6906_v56 }
 0x223   : > { %5172 = vmatprep.subr.bf16.mxu1 %v6907_v17 }
 0x226   : > { %5174 = vmatpush3.bf16.msra.mxu1 %v6907_v17 }
 0x227   : > { %5176 = vmatprep.subr.bf16.mxu1 %v6908_v22 }
 0x22a   : > { %5178 = vmatpush3.bf16.msra.mxu1 %v6908_v22 }
 0x22b   : > { %5180 = vmatprep.subr.bf16.mxu1 %v6922_v27 }
 0x2e0   : > { %v4597_v1 = vpop.f32.mrb[0].mxu1 }
 0x2e1   : > { %v6392_v32 = vsub.f32 %v6923_v2, %v4597_v1  ;;  %v1927_v45 = vpop.f32.mrb[1].mxu1 }
 0x2e2   : > { %v6395_v54 = vsub.f32 %v6924_v41, %v1927_v45 }
 0x2e3   : > { %v1982_v4 = vmul.f32 %v6392_v32, %v6392_v32 }
 0x2e4   : > { %v1981_v38 = vmul.f32 %v6395_v54, %v6395_v54  ;;  %v4600_v47 = vpop.f32.mrb[2].mxu1 }
 0x2e5   : > { %v6401_v51 = vand.u32 4294901760, %v1982_v4  ;;  %v6404_v57 = vsub.f32 %v6925_v14, %v4600_v47  ;;  %v1939_v28 = vpop.f32.mrb[3].mxu1  ;;  %v6929_v47 = vld [vmem:[#allocation19_spill] sm:$0xff] }
 0x2e6   : > { %v6406_v39 = vand.u32 4294901760, %v1981_v38  ;;  %v6409_v46 = vsub.f32 %v6926_v52, %v1939_v28 }
 0x2e7   : > { %v6412_v33 = vsub.f32 %v1982_v4, %v6401_v51  ;;  %v1984_v19 = vmul.f32 %v6404_v57, %v6404_v57 }
 0x2e8   : > { %v6417_v44 = vsub.f32 %v1981_v38, %v6406_v39  ;;  %v1983_v29 = vmul.f32 %v6409_v46, %v6409_v46  ;;  %v4603_v43 = vpop.f32.mrb[4].mxu1 }
 0x2e9   : > { %v6862_v12 = vand.u32 4294901760, %v6412_v33  ;;  %v6422_v9 = vand.u32 4294901760, %v1984_v19  ;;  %v6425_v20 = vsub.f32 %v6927_v50, %v4603_v43  ;;  %v1951_v49 = vpop.f32.mrb[5].mxu1 }
 0x2ea   : > { %v6427_v11 = vand.u32 4294901760, %v1983_v29  ;;  %v6430_v53 = vsub.f32 %v6928_v3, %v1951_v49  ;;  %v6863_v63 = vand.u32 4294901760, %v6417_v44 }
 0x2eb   : > { %v2083_v5 = vsub.f32 %v6412_v33, %v6862_v12  ;;  %v6437_v8 = vsub.f32 %v1984_v19, %v6422_v9  ;;  %v1986_v1 = vmul.f32 %v6425_v20, %v6425_v20 }
 0x2ec   : > { %v6442_v2 = vsub.f32 %v1983_v29, %v6427_v11  ;;  %v1985_v45 = vmul.f32 %v6430_v53, %v6430_v53  ;;  %v4606_v41 = vpop.f32.mrb[6].mxu1  ;;  %v2073_v4 = vsub.f32 %v6417_v44, %v6863_v63  ;;  %v6931_v29 = vld [vmem:[#allocation16_spill] sm:$0xff] }
 0x2ed   : > { %v6449_v38 = vand.u32 4294901760, %v1986_v1  ;;  %v6452_v14 = vsub.f32 %v6929_v47, %v4606_v41  ;;  %v1963_v28 = vpop.f32.mrb[7].mxu1  ;;  %v6864_v52 = vand.u32 4294901760, %v6437_v8  ;;  %v2084_v3 = vand.u32 4294901760, %v2083_v5 }
 0x2ee   : > { %v6455_v19 = vand.u32 4294901760, %v1985_v45  ;;  %v6458_v43 = vsub.f32 %v6931_v29, %v1963_v28  ;;  %v2074_v50 = vand.u32 4294901760, %v2073_v4  ;;  %v6866_v49 = vand.u32 4294901760, %v6442_v2 }
 0x2ef   : > { %6930 = vst [vmem:[#allocation20_spill] sm:$0xff] %v6452_v14  ;;  %v6462_v12 = vsub.f32 %v1986_v1, %v6449_v38  ;;  %v1988_v63 = vmul.f32 %v6452_v14, %v6452_v14  ;;  %v2103_v41 = vsub.f32 %v6437_v8, %v6864_v52 }
 0x2f0   : > { %6932 = vst [vmem:[#allocation7_spill] sm:$0xff] %v6458_v43  ;;  %v6470_v47 = vsub.f32 %v1985_v45, %v6455_v19  ;;  %v1987_v28 = vmul.f32 %v6458_v43, %v6458_v43  ;;  %4639 = vmatprep.mubr.f32.mxu1 %v2074_v50  ;;  %v2093_v5 = vsub.f32 %v6442_v2, %v6866_v49 }
 0x2f1   : > { %v6477_v1 = vand.u32 4294901760, %v1988_v63  ;;  %4640 = vmatmul.mubr.f32.vlgmr.msra.gmra.mrb[8].mxu1 %v2084_v3  ;;  %v2122_v4 = vand.u32 4294901760, %v6462_v12  ;;  %v2104_v50 = vand.u32 4294901760, %v2103_v41 }
 0x2f2   : > { %v6480_v29 = vand.u32 4294901760, %v1987_v28  ;;  %5182 = vmatpush3.bf16.msra.mxu1 %v6922_v27  ;;  %v2094_v52 = vand.u32 4294901760, %v2093_v5  ;;  %v2112_v45 = vand.u32 4294901760, %v6470_v47 }
 0x2f3   : > { %v6485_v14 = vsub.f32 %v1988_v63, %v6477_v1  ;;  %5184 = vmatprep.subr.bf16.mxu1 %v5937_v6  ;;  %v2123_v49 = vsub.f32 %v6462_v12, %v2122_v4 }
 0x2f4   : > { %v6492_v3 = vsub.f32 %v1987_v28, %v6480_v29  ;;  %4642 = vmatprep.mubr.f32.mxu1 %v2094_v52  ;;  %v2113_v27 = vsub.f32 %v6470_v47, %v2112_v45 }
 0x2f5   : > { %4643 = vmatmul.mubr.f32.gmra.mrb[10].mxu1 %v2104_v50  ;;  %v2142_v5 = vand.u32 4294901760, %v6485_v14  ;;  %v2124_v43 = vand.u32 4294901760, %v2123_v49 }
 0x2f6   : > { %5186 = vmatpush3.bf16.msra.mxu1 %v5937_v6  ;;  %v2114_v63 = vand.u32 4294901760, %v2113_v27  ;;  %v2132_v41 = vand.u32 4294901760, %v6492_v3 }
 0x2f7   : > { %5188 = vmatprep.subr.bf16.mxu1 %v5965_v18  ;;  %v2143_v28 = vsub.f32 %v6485_v14, %v2142_v5 }
 0x2f8   : > { %4645 = vmatprep.mubr.f32.mxu1 %v2114_v63  ;;  %v2133_v52 = vsub.f32 %v6492_v3, %v2132_v41 }
 0x2f9   : > { %4646 = vmatmul.mubr.f32.gmra.mrb[12].mxu1 %v2124_v43  ;;  %v2144_v6 = vand.u32 4294901760, %v2143_v28 }
 0x2fa   : > { %5190 = vmatpush3.bf16.msra.mxu1 %v5965_v18  ;;  %v2134_v50 = vand.u32 4294901760, %v2133_v52  ;;  %v6933_v18 = vand.u32 4294901760, %v6417_v44 }
 0x2fb   : > { %5192 = vmatprep.subr.bf16.mxu1 %v6082_v61 }
 0x2fc   : > { %4648 = vmatprep.mubr.f32.mxu1 %v2134_v50 }
 0x2fd   : > { %4649 = vmatmul.mubr.f32.gmra.mrb[14].mxu1 %v2144_v6 }
 0x2fe   : > { %5194 = vmatpush3.bf16.msra.mxu1 %v6082_v61  ;;  %4683 = vmatprep.mubr.f32.mxu1 %v6406_v39  ;;  %v6934_v61 = vand.u32 4294901760, %v6412_v33 }
 0x2ff   : > { %5196 = vmatprep.subr.bf16.mxu1 %v6086_v62 }
 0x302   : > { %5198 = vmatpush3.bf16.msra.mxu1 %v6086_v62  ;;  %v6935_v62 = vand.u32 4294901760, %v6442_v2 }
 0x303   : > { %5200 = vmatprep.subr.bf16.mxu1 %v6091_v55 }
 0x306   : > { %5202 = vmatpush3.bf16.msra.mxu1 %v6091_v55  ;;  %v6936_v55 = vand.u32 4294901760, %v6437_v8 }
 0x307   : > { %5204 = vmatprep.subr.bf16.mxu1 %v6099_v21 }
 0x30a   : > { %5206 = vmatpush3.bf16.msra.mxu1 %v6099_v21 }
 0x30b   : > { %5208 = vmatprep.subr.bf16.mxu1 %v6103_v37 }
 0x30e   : > { %5210 = vmatpush3.bf16.msra.mxu1 %v6103_v37 }
 0x30f   : > { %5212 = vmatprep.subr.bf16.mxu1 %v6109_v23 }
 0x311   : > { %4684 = vmatmul.mubr.f32.vlgmr.msra.gmra.mrb[8].mxu1 %v6401_v51 }
 0x312   : > { %4686 = vmatprep.mubr.f32.mxu1 %v6427_v11  ;;  %5214 = vmatpush3.bf16.msra.mxu1 %v6109_v23 }
 0x313   : > { %5216 = vmatprep.subr.bf16.mxu1 %v6115_v59 }
 0x315   : > { %4687 = vmatmul.mubr.f32.gmra.mrb[10].mxu1 %v6422_v9 }
 0x316   : > { %4689 = vmatprep.mubr.f32.mxu1 %v6455_v19  ;;  %5218 = vmatpush3.bf16.msra.mxu1 %v6115_v59 }
 0x317   : > { %5220 = vmatprep.subr.bf16.mxu1 %v6123_v24 }
 0x319   : > { %4690 = vmatmul.mubr.f32.gmra.mrb[12].mxu1 %v6449_v38 }
 0x31a   : > { %4692 = vmatprep.mubr.f32.mxu1 %v6480_v29  ;;  %5222 = vmatpush3.bf16.msra.mxu1 %v6123_v24 }
 0x31b   : > { %5224 = vmatprep.subr.bf16.mxu1 %v6131_v25 }
 0x31d   : > { %4693 = vmatmul.mubr.f32.gmra.mrb[14].mxu1 %v6477_v1 }
 0x31e   : > { %5226 = vmatpush3.bf16.msra.mxu1 %v6131_v25  ;;  %4727 = vmatprep.mubr.f32.mxu1 %v6417_v44 }
 0x31f   : > { %5228 = vmatprep.subr.bf16.mxu1 %v6139_v30 }
 0x322   : > { %5230 = vmatpush3.bf16.msra.mxu1 %v6139_v30 }
 0x323   : > { %5232 = vmatprep.subr.bf16.mxu1 %v6147_v31 }
 0x326   : > { %5234 = vmatpush3.bf16.msra.mxu1 %v6147_v31 }
 0x327   : > { %5236 = vmatprep.subr.bf16.mxu1 %v6153_v35 }
 0x32a   : > { %5238 = vmatpush3.bf16.msra.mxu1 %v6153_v35 }
 0x32b   : > { %5240 = vmatprep.subr.bf16.mxu1 %v6159_v36 }
 0x32e   : > { %5242 = vmatpush3.bf16.msra.mxu1 %v6159_v36 }
 0x32f   : > { %5244 = vmatprep.subr.bf16.mxu1 %v5722_v10 }
 0x331   : > { %4728 = vmatmul.mubr.f32.vlgmr.msra.gmra.mrb[8].mxu1 %v6412_v33 }
 0x332   : > { %4730 = vmatprep.mubr.f32.mxu1 %v6442_v2  ;;  %5246 = vmatpush3.bf16.msra.mxu1 %v5722_v10 }
 0x333   : > { %5248 = vmatprep.subr.bf16.mxu1 %v5724_v13 }
 0x335   : > { %4731 = vmatmul.mubr.f32.gmra.mrb[10].mxu1 %v6437_v8 }
 0x336   : > { %4733 = vmatprep.mubr.f32.mxu1 %v6470_v47  ;;  %5250 = vmatpush3.bf16.msra.mxu1 %v5724_v13 }
 0x337   : > { %5252 = vmatprep.subr.bf16.mxu1 %v6901_v40 }
 0x339   : > { %4734 = vmatmul.mubr.f32.gmra.mrb[12].mxu1 %v6462_v12 }
 0x33a   : > { %4736 = vmatprep.mubr.f32.mxu1 %v6492_v3  ;;  %5254 = vmatpush3.bf16.msra.mxu1 %v6901_v40 }
 0x33b   : > { %5256 = vmatprep.subr.bf16.mxu1 %v6903_v0 }
 0x33d   : > { %4737 = vmatmul.mubr.f32.gmra.mrb[14].mxu1 %v6485_v14 }
 0x33e   : > { %5258 = vmatpush3.bf16.msra.mxu1 %v6903_v0  ;;  %4771 = vmatprep.mubr.f32.mxu1 %v6933_v18 }
 0x33f   : > { %5260 = vmatprep.subr.bf16.mxu1 %v6905_v7 }
 0x342   : > { %5262 = vmatpush3.bf16.msra.mxu1 %v6905_v7 }
 0x343   : > { %5264 = vmatprep.subr.bf16.mxu1 %v6906_v56 }
 0x346   : > { %5266 = vmatpush3.bf16.msra.mxu1 %v6906_v56 }
 0x347   : > { %5268 = vmatprep.subr.bf16.mxu1 %v6907_v17 }
 0x34a   : > { %5270 = vmatpush3.bf16.msra.mxu1 %v6907_v17 }
 0x34b   : > { %5272 = vmatprep.subr.bf16.mxu1 %v6908_v22 }
 0x34e   : > { %5274 = vmatpush3.bf16.msra.mxu1 %v6908_v22 }
 0x34f   : > { %5276 = vmatprep.subr.bf16.mxu1 %v6041_v34 }
 0x351   : > { %4772 = vmatmul.mubr.f32.vlgmr.msra.gmra.mrb[8].mxu1 %v6934_v61 }
 0x352   : > { %4774 = vmatprep.mubr.f32.mxu1 %v6935_v62  ;;  %5278 = vmatpush3.bf16.msra.mxu1 %v6041_v34  ;;  %v6937_v34 = vld [vmem:[#allocation21_spill] sm:$0xff] }
 0x353   : > { %5280 = vmatprep.subr.bf16.mxu1 %v6048_v60 }
 0x355   : > { %4775 = vmatmul.mubr.f32.gmra.mrb[10].mxu1 %v6936_v55 }
 0x356   : > { %4777 = vmatprep.mubr.f32.mxu1 %v2112_v45  ;;  %5282 = vmatpush3.bf16.msra.mxu1 %v6048_v60  ;;  %v6938_v60 = vld [vmem:[#allocation22_spill] sm:$0xff] }
 0x357   : > { %5284 = vmatprep.subr.bf16.mxu1 %v6054_v26 }
 0x359   : > { %4778 = vmatmul.mubr.f32.gmra.mrb[12].mxu1 %v2122_v4 }
 0x35a   : > { %4780 = vmatprep.mubr.f32.mxu1 %v2132_v41  ;;  %5286 = vmatpush3.bf16.msra.mxu1 %v6054_v26  ;;  %v6939_v26 = vld [vmem:[#allocation23_spill] sm:$0xff] }
 0x35b   : > { %5288 = vmatprep.subr.bf16.mxu1 %v6058_v16 }
 0x35d   : > { %4781 = vmatmul.mubr.f32.gmra.mrb[14].mxu1 %v2142_v5 }
 0x35e   : > { %5290 = vmatpush3.bf16.msra.mxu1 %v6058_v16  ;;  %4815 = vmatprep.mubr.f32.mxu1 %v6406_v39 }
 0x35f   : > { %5292 = vmatprep.subr.bf16.mxu1 %v6064_v15 }
 0x362   : > { %5294 = vmatpush3.bf16.msra.mxu1 %v6064_v15 }
 0x363   : > { %5296 = vmatprep.subr.bf16.mxu1 %v6937_v34 }
 0x366   : > { %5298 = vmatpush3.bf16.msra.mxu1 %v6937_v34 }
 0x367   : > { %5300 = vmatprep.subr.bf16.mxu1 %v6938_v60 }
 0x36a   : > { %5302 = vmatpush3.bf16.msra.mxu1 %v6938_v60 }
 0x36b   : > { %5304 = vmatprep.subr.bf16.mxu1 %v6939_v26 }
 0x36e   : > { %5306 = vmatpush3.bf16.msra.mxu1 %v6939_v26 }
 0x36f   : > { %5308 = vmatprep.subr.bf16.mxu1 %v5722_v10 }
 0x371   : > { %4816 = vmatmul.mubr.f32.vlgmr.msra.gmra.mrb[8].mxu1 %v6401_v51 }
 0x372   : > { %4818 = vmatprep.mubr.f32.mxu1 %v6427_v11  ;;  %5310 = vmatpush3.bf16.msra.mxu1 %v5722_v10 }
 0x373   : > { %5312 = vmatprep.subr.bf16.mxu1 %v5724_v13 }
 0x375   : > { %4819 = vmatmul.mubr.f32.gmra.mrb[10].mxu1 %v6422_v9 }
 0x376   : > { %4821 = vmatprep.mubr.f32.mxu1 %v6455_v19  ;;  %5314 = vmatpush3.bf16.msra.mxu1 %v5724_v13 }
 0x377   : > { %5316 = vmatprep.subr.bf16.mxu1 %v6901_v40 }
 0x379   : > { %4822 = vmatmul.mubr.f32.gmra.mrb[12].mxu1 %v6449_v38 }
 0x37a   : > { %4824 = vmatprep.mubr.f32.mxu1 %v6480_v29  ;;  %5318 = vmatpush3.bf16.msra.mxu1 %v6901_v40 }
 0x37b   : > { %5320 = vmatprep.subr.bf16.mxu1 %v6903_v0 }
 0x37d   : > { %4825 = vmatmul.mubr.f32.gmra.mrb[14].mxu1 %v6477_v1 }
 0x37e   : > { %5322 = vmatpush3.bf16.msra.mxu1 %v6903_v0  ;;  %4859 = vmatprep.mubr.f32.mxu1 %v6406_v39 }
 0x37f   : > { %5324 = vmatprep.subr.bf16.mxu1 %v6905_v7 }
 0x382   : > { %5326 = vmatpush3.bf16.msra.mxu1 %v6905_v7 }
 0x383   : > { %5328 = vmatprep.subr.bf16.mxu1 %v6906_v56 }
 0x386   : > { %5330 = vmatpush3.bf16.msra.mxu1 %v6906_v56 }
 0x387   : > { %5332 = vmatprep.subr.bf16.mxu1 %v6907_v17 }
 0x38a   : > { %5334 = vmatpush3.bf16.msra.mxu1 %v6907_v17 }
 0x38b   : > { %5336 = vmatprep.subr.bf16.mxu1 %v6908_v22 }
 0x38e   : > { %5338 = vmatpush3.bf16.msra.mxu1 %v6908_v22 }
 0x38f   : > { %5339 = vmatprep.subr.mxu1 %v6254_v42 }
 0x391   : > { %4860 = vmatmul.mubr.f32.vlgmr.msra.gmra.mrb[8].mxu1 %v6401_v51 }
 0x392   : > { %4862 = vmatprep.mubr.f32.mxu1 %v6427_v11  ;;  %5340 = vmatpush3.msra.mxu1 %v6254_v42 }
 0x395   : > { %4863 = vmatmul.mubr.f32.gmra.mrb[10].mxu1 %v6422_v9 }
 0x396   : > { %4865 = vmatprep.mubr.f32.mxu1 %v6455_v19 }
 0x399   : > { %4866 = vmatmul.mubr.f32.gmra.mrb[12].mxu1 %v6449_v38 }
 0x39a   : > { %4868 = vmatprep.mubr.f32.mxu1 %v6480_v29 }
 0x39d   : > { %4869 = vmatmul.mubr.f32.gmra.mrb[14].mxu1 %v6477_v1 }
 0x464   : > { %v4861_v10 = vpop.f32.mrb[8].mxu1 }
 0x465   : > { %v2932_v13 = vmul.f32 0.03125, %v4861_v10  ;;  %v2885_v16 = vpop.f32.mrb[9].mxu1 }
 0x466   : > { %v2931_v15 = vmul.f32 0.03125, %v2885_v16 }
 0x467   : > { %v2940_v21 = vadd.f32 1e-05, %v2932_v13 }
 0x468   : > { %v2939_v37 = vadd.f32 1e-05, %v2931_v15  ;;  %v4864_v23 = vpop.f32.mrb[10].mxu1 }
 0x469   : > { %5542 = vrsqrt.f32 %v2940_v21  ;;  %v2934_v59 = vmul.f32 0.03125, %v4864_v23  ;;  %v2897_v24 = vpop.f32.mrb[11].mxu1 }
 0x46a   : > { %5544 = vrsqrt.f32 %v2939_v37  ;;  %v2933_v25 = vmul.f32 0.03125, %v2897_v24 }
 0x46b   : > { %v2942_v30 = vadd.f32 1e-05, %v2934_v59 }
 0x46c   : > { %v2941_v31 = vadd.f32 1e-05, %v2933_v25  ;;  %v4867_v35 = vpop.f32.mrb[12].mxu1  ;;  %v6940_v25 = vld [vmem:[#allocation5_spill] sm:$0xff] }
 0x46d   : > { %5546 = vrsqrt.f32 %v2942_v30  ;;  %v2936_v36 = vmul.f32 0.03125, %v4867_v35  ;;  %v2909_v40 = vpop.f32.mrb[13].mxu1 }
 0x46e   : > { %5548 = vrsqrt.f32 %v2941_v31  ;;  %v2935_v0 = vmul.f32 0.03125, %v2909_v40 }
 0x46f   : > { %v2944_v7 = vadd.f32 1e-05, %v2936_v36 }
 0x470   : > { %v2943_v56 = vadd.f32 1e-05, %v2935_v0  ;;  %v4870_v17 = vpop.f32.mrb[14].mxu1 }
 0x471   : > { %5550 = vrsqrt.f32 %v2944_v7  ;;  %v2938_v22 = vmul.f32 0.03125, %v4870_v17  ;;  %v2921_v51 = vpop.f32.mrb[15].mxu1 }
 0x472   : > { %5552 = vrsqrt.f32 %v2943_v56  ;;  %v2937_v39 = vmul.f32 0.03125, %v2921_v51 }
 0x473   : > { %v5543_v33 = vpop.eup %5542  ;;  %v2946_v44 = vadd.f32 1e-05, %v2938_v22 }
 0x474   : > { %v5545_v12 = vpop.eup %5544  ;;  %v2959_v9 = vsel %vm1201_vm0, %v5543_v33, 0  ;;  %v2945_v11 = vadd.f32 1e-05, %v2937_v39 }
 0x475   : > { %v6633_v8 = vand.u32 4294901760, %v2959_v9  ;;  %5554 = vrsqrt.f32 %v2946_v44  ;;  %v2956_v2 = vsel %vm1201_vm0, %v5545_v12, 0 }
 0x476   : > { %5556 = vrsqrt.f32 %v2945_v11  ;;  %v6636_v38 = vand.u32 4294901760, %v2956_v2  ;;  %v3855_v11 = vld [vmem:[%s6811_s3] ss:$0 sm:$0xff] }
 0x477   : > { %v5547_v14 = vpop.eup %5546  ;;  %v6639_v19 = vsub.f32 %v2959_v9, %v6633_v8 }
 0x478   : > { %v5549_v43 = vpop.eup %5548  ;;  %v6642_v49 = vsub.f32 %v2956_v2, %v6636_v38  ;;  %v2965_v47 = vsel %vm1201_vm0, %v5547_v14, 0 }
 0x479   : > { %v3057_v1 = vand.u32 4294901760, %v6639_v19  ;;  %v2962_v4 = vsel %vm1201_vm0, %v5549_v43, 0  ;;  %v6647_v29 = vand.u32 4294901760, %v2965_v47 }
 0x47a   : > { %v3047_v45 = vand.u32 4294901760, %v6642_v49  ;;  %v6650_v3 = vand.u32 4294901760, %v2962_v4 }
 0x47b   : > { %v5551_v27 = vpop.eup %5550  ;;  %v3058_v5 = vsub.f32 %v6639_v19, %v3057_v1  ;;  %v6656_v63 = vsub.f32 %v2965_v47, %v6647_v29 }
 0x47c   : > { %v5553_v41 = vpop.eup %5552  ;;  %v3048_v28 = vsub.f32 %v6642_v49, %v3047_v45  ;;  %v6662_v52 = vsub.f32 %v2962_v4, %v6650_v3  ;;  %v2971_v50 = vsel %vm1201_vm0, %v5551_v27, 0 }
 0x47d   : > { %v3077_v6 = vand.u32 4294901760, %v6656_v63  ;;  %v2968_v18 = vsel %vm1201_vm0, %v5553_v41, 0  ;;  %v6667_v61 = vand.u32 4294901760, %v2971_v50  ;;  %v3059_v26 = vand.u32 4294901760, %v3058_v5 }
 0x47e   : > { %v3049_v62 = vand.u32 4294901760, %v3048_v28  ;;  %v3067_v55 = vand.u32 4294901760, %v6662_v52  ;;  %v6670_v34 = vand.u32 4294901760, %v2968_v18 }
 0x47f   : > { %v5555_v60 = vpop.eup %5554  ;;  %v3078_v10 = vsub.f32 %v6656_v63, %v3077_v6  ;;  %v3096_v13 = vsub.f32 %v2971_v50, %v6667_v61 }
 0x480   : > { %v5557_v16 = vpop.eup %5556  ;;  %v2977_v15 = vsel %vm1201_vm0, %v5555_v60, 0  ;;  %4873 = vmatprep.mubr.f32.mxu0 %v3049_v62  ;;  %v3068_v21 = vsub.f32 %v6662_v52, %v3067_v55  ;;  %v3086_v37 = vsub.f32 %v2968_v18, %v6670_v34  ;;  %v6941_v62 = vld [vmem:[#allocation20_spill] sm:$0xff] }
 0x481   : > { %v6679_v23 = vand.u32 4294901760, %v2977_v15  ;;  %4874 = vmatmul.mubr.f32.vlgmr.msra.gmra.mrb[8].mxu0 %v3059_v26  ;;  %v3097_v59 = vand.u32 4294901760, %v3096_v13  ;;  %v2974_v24 = vsel %vm1201_vm0, %v5557_v16, 0  ;;  %v3079_v40 = vand.u32 4294901760, %v3078_v10 }
 0x482   : > { %4886 = vmatpush3.msra.mxu0 %v6940_v25  ;;  %v3069_v30 = vand.u32 4294901760, %v3068_v21  ;;  %v3087_v31 = vand.u32 4294901760, %v3086_v37  ;;  %v6683_v35 = vand.u32 4294901760, %v2974_v24 }
 0x483   : > { %v3116_v36 = vsub.f32 %v2977_v15, %v6679_v23  ;;  %v3098_v0 = vsub.f32 %v3096_v13, %v3097_v59  ;;  %4899 = vmatprep.subr.mxu0 %v6261_v48 }
 0x484   : > { %4876 = vmatprep.mubr.f32.mxu0 %v3069_v30  ;;  %v3088_v7 = vsub.f32 %v3086_v37, %v3087_v31  ;;  %v3106_v56 = vsub.f32 %v2974_v24, %v6683_v35 }
 0x485   : > { %4877 = vmatmul.mubr.f32.gmra.mrb[10].mxu0 %v3079_v40  ;;  %v3117_v17 = vand.u32 4294901760, %v3116_v36  ;;  %v3099_v39 = vand.u32 4294901760, %v3098_v0 }
 0x486   : > { %v3089_v22 = vand.u32 4294901760, %v3088_v7  ;;  %v3107_v51 = vand.u32 4294901760, %v3106_v56 }
 0x487   : > { %v3118_v33 = vsub.f32 %v3116_v36, %v3117_v17 }
 0x488   : > { %4879 = vmatprep.mubr.f32.mxu0 %v3089_v22  ;;  %v3108_v44 = vsub.f32 %v3106_v56, %v3107_v51 }
 0x489   : > { %4880 = vmatmul.mubr.f32.gmra.mrb[12].mxu0 %v3099_v39  ;;  %v3119_v9 = vand.u32 4294901760, %v3118_v33 }
 0x48a   : > { %4887 = vmatprep.mubr.f32.mxu0 %v6636_v38  ;;  %v3109_v12 = vand.u32 4294901760, %v3108_v44 }
 0x48c   : > { %4882 = vmatprep.mubr.f32.mxu1 %v3109_v12 }
 0x48d   : > { %4883 = vmatmul.mubr.f32.vlgmr.msra.gmra.mrb[16].mxu1 %v3119_v9  ;;  %4888 = vmatmul.mubr.f32.vlgmr.msra.gmra.mrb[8].mxu0 %v6633_v8 }
 0x48e   : > { %4900 = vmatpush3.msra.mxu0 %v6261_v48  ;;  %4890 = vmatprep.mubr.f32.mxu0 %v6650_v3 }
 0x48f   : > { %4913 = vmatprep.subr.mxu0 %v6254_v42 }
 0x491   : > { %4891 = vmatmul.mubr.f32.gmra.mrb[10].mxu0 %v6647_v29 }
 0x492   : > { %4893 = vmatprep.mubr.f32.mxu0 %v6670_v34 }
 0x495   : > { %4894 = vmatmul.mubr.f32.gmra.mrb[12].mxu0 %v6667_v61 }
 0x496   : > { %4896 = vmatprep.mubr.f32.mxu0 %v6683_v35 }
 0x499   : > { %4897 = vmatmul.mubr.f32.gmra.mrb[14].mxu0 %v6679_v23 }
 0x49a   : > { %4901 = vmatprep.mubr.f32.mxu0 %v6642_v49 }
 0x49d   : > { %4902 = vmatmul.mubr.f32.vlgmr.msra.gmra.mrb[8].mxu0 %v6639_v19 }
 0x49e   : > { %4914 = vmatpush3.msra.mxu0 %v6254_v42  ;;  %4904 = vmatprep.mubr.f32.mxu0 %v6662_v52 }
 0x49f   : > { %4927 = vmatprep.subr.mxu0 %v6264_v58 }
 0x4a1   : > { %4905 = vmatmul.mubr.f32.gmra.mrb[10].mxu0 %v6656_v63 }
 0x4a2   : > { %4907 = vmatprep.mubr.f32.mxu0 %v3086_v37 }
 0x4a5   : > { %4908 = vmatmul.mubr.f32.gmra.mrb[12].mxu0 %v3096_v13 }
 0x4a6   : > { %4910 = vmatprep.mubr.f32.mxu0 %v3106_v56 }
 0x4a9   : > { %4911 = vmatmul.mubr.f32.gmra.mrb[14].mxu0 %v3116_v36 }
 0x4aa   : > { %4915 = vmatprep.mubr.f32.mxu0 %v3047_v45 }
 0x4ad   : > { %4916 = vmatmul.mubr.f32.vlgmr.msra.gmra.mrb[8].mxu0 %v3057_v1 }
 0x4ae   : > { %4928 = vmatpush3.msra.mxu0 %v6264_v58  ;;  %4918 = vmatprep.mubr.f32.mxu0 %v3067_v55 }
 0x4af   : > { %4941 = vmatprep.subr.mxu0 %v6254_v42 }
 0x4b1   : > { %4919 = vmatmul.mubr.f32.gmra.mrb[10].mxu0 %v3077_v6 }
 0x4b2   : > { %4921 = vmatprep.mubr.f32.mxu0 %v3087_v31 }
 0x4b5   : > { %4922 = vmatmul.mubr.f32.gmra.mrb[12].mxu0 %v3097_v59 }
 0x4b6   : > { %4924 = vmatprep.mubr.f32.mxu0 %v3107_v51 }
 0x4b9   : > { %4925 = vmatmul.mubr.f32.gmra.mrb[14].mxu0 %v3117_v17 }
 0x4ba   : > { %4929 = vmatprep.mubr.f32.mxu0 %v6636_v38 }
 0x4bd   : > { %4930 = vmatmul.mubr.f32.vlgmr.msra.gmra.mrb[8].mxu0 %v6633_v8 }
 0x4be   : > { %4942 = vmatpush3.msra.mxu0 %v6254_v42  ;;  %4932 = vmatprep.mubr.f32.mxu0 %v6650_v3 }
 0x4c1   : > { %4933 = vmatmul.mubr.f32.gmra.mrb[10].mxu0 %v6647_v29 }
 0x4c2   : > { %4935 = vmatprep.mubr.f32.mxu0 %v6670_v34 }
 0x4c5   : > { %4936 = vmatmul.mubr.f32.gmra.mrb[12].mxu0 %v6667_v61 }
 0x4c6   : > { %4938 = vmatprep.mubr.f32.mxu0 %v6683_v35 }
 0x4c9   : > { %4939 = vmatmul.mubr.f32.gmra.mrb[14].mxu0 %v6679_v23 }
 0x4ca   : > { %4943 = vmatprep.mubr.f32.mxu0 %v6636_v38  ;;  %v3856_v38 = vld [vmem:[%s6812_s4] ss:$0 sm:$0xff] }
 0x4cd   : > { %4944 = vmatmul.mubr.f32.vlgmr.msra.gmra.mrb[8].mxu0 %v6633_v8 }
 0x4ce   : > { %4946 = vmatprep.mubr.f32.mxu0 %v6650_v3 }
 0x4d1   : > { %4947 = vmatmul.mubr.f32.gmra.mrb[10].mxu0 %v6647_v29 }
 0x4d2   : > { %4949 = vmatprep.mubr.f32.mxu0 %v6670_v34 }
 0x4d5   : > { %4950 = vmatmul.mubr.f32.gmra.mrb[12].mxu0 %v6667_v61 }
 0x4d6   : > { %4952 = vmatprep.mubr.f32.mxu0 %v6683_v35 }
 0x4d9   : > { %4953 = vmatmul.mubr.f32.gmra.mrb[14].mxu0 %v6679_v23 }
 0x560   : > { %v4884_v42 = vpop.f32.mrb[16].mxu1 }
 0x561   : > { %v3111_v48 = vpop.f32.mrb[17].mxu1 }
 0x5a0   : > { %v4945_v58 = vpop.f32.mrb[8].mxu0 }
 0x5a1   : > { %v3727_v8 = vmul.f32 %v4945_v58, %v6392_v32  ;;  %v3680_v2 = vpop.f32.mrb[9].mxu0 }
 0x5a2   : > { %v3726_v14 = vmul.f32 %v3680_v2, %v6395_v54 }
 0x5a3   : > { %v3742_v19 = vmul.f32 %v3855_v11, %v3727_v8 }
 0x5a4   : > { %v3741_v43 = vmul.f32 %v3855_v11, %v3726_v14  ;;  %v4948_v49 = vpop.f32.mrb[10].mxu0 }
 0x5a5   : > { %v3757_v47 = vadd.f32 %v3856_v38, %v3742_v19  ;;  %v3729_v1 = vmul.f32 %v4948_v49, %v6404_v57  ;;  %v3692_v4 = vpop.f32.mrb[11].mxu0 }
 0x5a6   : > { %v3756_v29 = vadd.f32 %v3856_v38, %v3741_v43  ;;  %v3728_v45 = vmul.f32 %v3692_v4, %v6409_v46 }
 0x5a7   : > { %3765 = vst [vmem:[%s6742_s23 + $0x8] sm:$0xff] %v3757_v47  ;;  %v3744_v32 = vmul.f32 %v3855_v11, %v3729_v1 }
 0x5a8   : > { %3764 = vst [vmem:[%s6742_s23] sm:$0xff] %v3756_v29  ;;  %v3743_v54 = vmul.f32 %v3855_v11, %v3728_v45  ;;  %v4951_v3 = vpop.f32.mrb[12].mxu0 }
 0x5a9   : > { %v3759_v27 = vadd.f32 %v3856_v38, %v3744_v32  ;;  %v3731_v5 = vmul.f32 %v4951_v3, %v6425_v20  ;;  %v3704_v57 = vpop.f32.mrb[13].mxu0 }
 0x5aa   : > { %v3758_v63 = vadd.f32 %v3856_v38, %v3743_v54  ;;  %v3730_v46 = vmul.f32 %v3704_v57, %v6430_v53  ;;  %v6942_v53 = vld [vmem:[#allocation7_spill] sm:$0xff] }
 0x5ab   : > { %3767 = vst [vmem:[%s6742_s23 + $0x18] sm:$0xff] %v3759_v27  ;;  %v3746_v41 = vmul.f32 %v3855_v11, %v3731_v5 }
 0x5ac   : > { %3766 = vst [vmem:[%s6742_s23 + $0x10] sm:$0xff] %v3758_v63  ;;  %v3745_v28 = vmul.f32 %v3855_v11, %v3730_v46  ;;  %v4954_v52 = vpop.f32.mrb[14].mxu0 }
 0x5ad   : > { %v3761_v50 = vadd.f32 %v3856_v38, %v3746_v41  ;;  %v5341_v6 = vadd.f32 %v4954_v52, %v4884_v42  ;;  %v3716_v18 = vpop.f32.mrb[15].mxu0 }
 0x5ae   : > { %v3760_v61 = vadd.f32 %v3856_v38, %v3745_v28  ;;  %v5342_v20 = vadd.f32 %v3716_v18, %v3111_v48 }
 0x5af   : > { %3769 = vst [vmem:[%s6742_s23 + $0x28] sm:$0xff] %v3761_v50  ;;  %v3733_v55 = vmul.f32 %v5341_v6, %v6941_v62 }
 0x5b0   : > { %3768 = vst [vmem:[%s6742_s23 + $0x20] sm:$0xff] %v3760_v61  ;;  %v3732_v34 = vmul.f32 %v5342_v20, %v6942_v53 }
 0x5b1   : > { %v3748_v60 = vmul.f32 %v3855_v11, %v3733_v55 }
 0x5b2   : > { %v3747_v26 = vmul.f32 %v3855_v11, %v3732_v34 }
 0x5b3   : > { %v3763_v10 = vadd.f32 %v3856_v38, %v3748_v60 }
 0x5b4   : > { %v3762_v13 = vadd.f32 %v3856_v38, %v3747_v26 }
 0x5b5   : > { %3771 = vst [vmem:[%s6742_s23 + $0x38] sm:$0xff] %v3763_v10 }
 0x5b6   : > { %3770 = vst [vmem:[%s6742_s23 + $0x30] sm:$0xff] %v3762_v13 }
 0x5b7   : > { %5571 = shalt.err (!%p5568_p3)
}
 0x5b8   : > { %s5572_s13 = scalar_lea.hbm %s6759_s7, 1024  ;;  %s5576_s15 = scalar_lea.hbm %s6813_s5, 2048 }
 0x5b9   : > { %p5573_p4 = scmp.ne.s32.totalorder %s6759_s7, %s5572_s13  ;;  %p5577_p9 = scmp.lt.u32.totalorder %s6759_s7, %s6813_s5 }
 0x5ba   : > { %p5578_p10 = scmp.lt.u32.totalorder %s5576_s15, %s5572_s13  ;;  %p5580_p12 = scmp.lt.u32.totalorder %s5572_s13, %s6759_s7 }
 0x5bb   : > { %p5574_p7 = pnand %p5573_p4, %p5693_p5 }
 0x5bc   : > { %p5579_p11 = por %p5578_p10, %p5577_p9 }
 0x5bd   : > { %p5575_p8 = pneg %p5574_p7 }
 0x5be   : > { %p5581_p13 = por %p5580_p12, %p5579_p11 }
 0x5c0   : > { %p5582_p0 = pnand %p5581_p13, %p5575_p8 }
 0x5c2   : > { %5585 = shalt.err (!%p5582_p0)
}
 0x5c3   : > { %s5623_s23 = smov 128   ;;  %s5624_s25 = smov 8  }
 0x5c4   : > { %5501 = dma.vmem_to_hbm [thread:$0]  (%p5693_p5), %s6761_s26, 1024, %s6759_s7, %s6767_s8, %s5623_s23, %s5623_s23, %s5624_s25  }
 0x5c5 PF: > { %p5507_p1 = scmp.ge.s32.totalorder %s5620_s21, 2  ;;  %s3801_s30 = sand.u32 1, %s5608_s18  }
 0x5c6   : > { %s3802_s6 = scalar_lea.sflag [#allocation3], %s3801_s30 }
 0x5c7   : > { %p5504_p2 = pnand %p5507_p1, %p5697_p6 }
 0x5c9   : > { %5603 = dma.done.wait (!%p5504_p2), %s3802_s6, 1024  }
 0x5ca   : > { %5605 = vsyncadd (!%p5504_p2), %s3802_s6, 4294966272  ;;  %p15_p3 = scmp.ge.s32.totalorder %s5680_s24, 4   ;;  %s6943_s18 = smov %s5612_s19 }
 0x5cb   : > { %s6944_s19 = smov %s5616_s20  ;;  %s6945_s20 = smov %s5691_s27 }
 0x5cc   : > { %s6946_s21 = smov %s5680_s24  ;;  %17 = sbr.rel (!%p15_p3) target bundleno = 3 (0x3), region = 75 }
 0x5d3   :  { %3807 = vsyncpa [#allocation3], 1 }
 0x5d4   :  { %3809 = vsyncpa [#allocation3 + $0x1], 1 }

</bundles_post_ra>
